<compile_context>
chip_gen: v7x
topology: tpu7x:2x2x1
jax: 0.10.0
libtpu: 0.0.40
codegen_flags: <defaults>
</compile_context>

<pallas_src>
import functools
import math

import jax
import jax.numpy as jnp
from jax.experimental import pallas as pl
from jax.experimental.pallas import tpu as pltpu


def _round_up(x, m):
    return ((x + m - 1) // m) * m


def _pick_tc(cin_p):
    """Largest K-block <= 512 that tiles the (128-padded) reduction dim."""
    if cin_p <= 512:
        return cin_p
    for cand in (512, 384, 256, 128):
        if cin_p % cand == 0:
            return cand
    raise ValueError(f"cannot tile reduction dim {cin_p}")


# ----------------------------------------------------------------------------
# Pallas kernel: fused (im2col-free along d/h) conv GEMM + bias + optional ReLU
# ----------------------------------------------------------------------------
def _conv_gemm_kernel(x_ref, w_ref, b_ref, o_ref, acc_ref, *,
                      tap_offsets, tm, relu, nk, single_m):
    """Grid = (M blocks, Cout blocks, K blocks); K is the reduction axis.

    x_ref : (P2, tc)      bf16 activation rows (whole row slab resident)
    w_ref : (T,  tc, tn)  bf16 weight taps for this (K, Cout) block
    b_ref : (1,  tn)      f32 folded bias
    o_ref : (tm, tn)      output block
    acc_ref: (tm, tn)     f32 accumulator scratch (used only when nk > 1)
    """
    k = pl.program_id(2)

    # Local accumulation: one chained sum over the (few) taps, then a single
    # accumulator update per grid step.
    acc = None
    for t, off in enumerate(tap_offsets):
        if single_m:
            start = off                                   # fully static slice
        else:
            start = pl.multiple_of(pl.program_id(0) * tm + off, 8)
        a = x_ref[pl.ds(start, tm), :]                    # (tm, tc) bf16
        d = jnp.dot(a, w_ref[t], preferred_element_type=jnp.float32)
        acc = d if acc is None else acc + d

    def _finish(total):
        y = total + b_ref[...]
        if relu:
            y = jnp.maximum(y, 0.0)
        o_ref[...] = y.astype(o_ref.dtype)

    if nk == 1:
        _finish(acc)                                      # no scratch round trip
    else:
        @pl.when(k == 0)
        def _():
            acc_ref[...] = acc

        @pl.when(jnp.logical_and(k > 0, k < nk - 1))
        def _():
            acc_ref[...] += acc

        @pl.when(k == nk - 1)
        def _():
            _finish(acc_ref[...] + acc)


# ----------------------------------------------------------------------------
# Wrapper: "sum over taps of shifted-row matmuls"
# ----------------------------------------------------------------------------
def _conv_gemm(x2, w_taps, bias_p, tap_offsets, m_rows, relu, out_dtype):
    """y[q, co] = act( sum_t  x2[q + off_t, :] @ w_taps[t]  + bias ) for
    q in [0, m_rows).  x2:(P, cin_used) bf16, w_taps:(T, cin_p, cout_p) bf16,
    bias_p:(1, cout_p) f32.  Returns (mp, cout_p); caller slices valid rows/cols.
    """
    P, cin_used = x2.shape
    T, cin_p, cout_p = w_taps.shape

    tc = _pick_tc(cin_p)
    tn = min(cout_p, 256)

    if m_rows <= 1024:
        tm = _round_up(m_rows, 8)          # single M block
    else:
        tm = 1024                          # >=2 parallel M blocks (v7x megacore)
    mp = _round_up(m_rows, tm)

    max_off = max(tap_offsets)
    p2 = _round_up(mp + max_off, 8)        # rows the kernel may touch (zero pad)

    x2 = x2.astype(jnp.bfloat16)
    if p2 > P or cin_p > cin_used:
        x2 = jnp.pad(x2, ((0, p2 - P), (0, cin_p - cin_used)))

    nk = cin_p // tc
    grid = (mp // tm, cout_p // tn, nk)

    kernel = functools.partial(
        _conv_gemm_kernel,
        tap_offsets=tuple(int(o) for o in tap_offsets),
        tm=tm, relu=relu, nk=nk, single_m=(grid[0] == 1))

    out = pl.pallas_call(
        kernel,
        out_shape=jax.ShapeDtypeStruct((mp, cout_p), out_dtype),
        grid_spec=pltpu.PrefetchScalarGridSpec(
            num_scalar_prefetch=0,
            grid=grid,
            in_specs=[
                pl.BlockSpec((p2, tc), lambda i, j, k: (0, k)),        # activation
                pl.BlockSpec((T, tc, tn), lambda i, j, k: (0, k, j)),  # weights
                pl.BlockSpec((1, tn), lambda i, j, k: (0, j)),         # bias
            ],
            out_specs=pl.BlockSpec((tm, tn), lambda i, j, k: (i, j)),
            scratch_shapes=[pltpu.VMEM((tm, tn), jnp.float32)],
        ),
        compiler_params=pltpu.CompilerParams(
            dimension_semantics=("parallel", "parallel", "arbitrary"),
            vmem_limit_bytes=48 * 1024 * 1024),
    )(x2, w_taps, bias_p)
    return out


# ----------------------------------------------------------------------------
# Conv layers (glue = pad / slice / reshape; all matmul FLOPs are Pallas)
# ----------------------------------------------------------------------------
def conv3x3(x, p, cout, relu=True):
    """x: (N, D, H, W, Cin) bf16, p['w']: (9, pad(3*Cin), pad(Cout)) bf16."""
    N, D, H, W, cin = x.shape
    Dp, Hp = D + 2, H + 2
    Wpa = _round_up(W + 2, 8)              # sublane-aligned padded width

    # Spatial zero-pad + fold kw into channels (w-im2col): row q carries
    # concat_kw x_pad[d, h, w + kw, :]  (3*Cin channels).
    xp = jnp.pad(x, ((0, 0), (1, 1), (1, 1), (1, Wpa - W + 1), (0, 0)))
    x3 = jnp.concatenate([xp[:, :, :, 0:Wpa, :],
                          xp[:, :, :, 1:Wpa + 1, :],
                          xp[:, :, :, 2:Wpa + 2, :]], axis=-1)
    m_rows = N * Dp * Hp * Wpa
    x2 = x3.reshape(m_rows, 3 * cin)

    # Remaining tap offsets (kd, kh only) — all multiples of 8.
    offs = tuple(kd * Hp * Wpa + kh * Wpa for kd in range(3) for kh in range(3))

    y2 = _conv_gemm(x2, p["w"], p["b"], offs, m_rows, relu, jnp.bfloat16)
    y = y2[:m_rows, :cout].reshape(N, Dp, Hp, Wpa, cout)[:, :D, :H, :W, :]
    return y


def conv1x1(x, p, cout, relu=False, out_dtype=jnp.bfloat16):
    N, D, H, W, cin = x.shape
    m_rows = N * D * H * W
    y2 = _conv_gemm(x.reshape(m_rows, cin), p["w"], p["b"], (0,),
                    m_rows, relu, out_dtype)
    return y2[:m_rows, :cout].reshape(N, D, H, W, cout)


def maxpool2(x):
    N, D, H, W, C = x.shape
    return x.reshape(N, D // 2, 2, H // 2, 2, W // 2, 2, C).max(axis=(2, 4, 6))


def upsample2(x):
    """Nearest-neighbour 2x upsample as a single broadcast + reshape."""
    N, D, H, W, C = x.shape
    y = jnp.broadcast_to(x[:, :, None, :, None, :, None, :],
                         (N, D, 2, H, 2, W, 2, C))
    return y.reshape(N, 2 * D, 2 * H, 2 * W, C)


# ----------------------------------------------------------------------------
# Model blocks (R2U_Net)
# ----------------------------------------------------------------------------
def recurrent_block(x, p, cout, t=2):
    # PyTorch Recurrent_block.forward (shared conv weights across applications)
    x1 = None
    for i in range(t):
        if i == 0:
            x1 = conv3x3(x, p, cout, relu=True)
        x1 = conv3x3(x + x1, p, cout, relu=True)
    return x1


def rrcnn_block(x, p, cout, t=2):
    x = conv1x1(x, p["c1x1"], cout, relu=False)
    x1 = recurrent_block(x, p["rec1"], cout, t)
    x1 = recurrent_block(x1, p["rec2"], cout, t)
    return x + x1


def up_conv_block(x, p, cout):
    return conv3x3(upsample2(x), p, cout, relu=True)


def r2u_net_forward(x_ncdhw, params):
    x = jnp.transpose(x_ncdhw, (0, 2, 3, 4, 1)).astype(jnp.bfloat16)  # -> NDHWC

    x1 = rrcnn_block(x, params["rrcnn1"], 64)
    x2 = rrcnn_block(maxpool2(x1), params["rrcnn2"], 128)
    x3 = rrcnn_block(maxpool2(x2), params["rrcnn3"], 256)
    x4 = rrcnn_block(maxpool2(x3), params["rrcnn4"], 512)
    x5 = rrcnn_block(maxpool2(x4), params["rrcnn5"], 1024)

    d5 = up_conv_block(x5, params["up5"], 512)
    d5 = rrcnn_block(jnp.concatenate([x4, d5], axis=-1), params["up_rrcnn5"], 512)
    d4 = up_conv_block(d5, params["up4"], 256)
    d4 = rrcnn_block(jnp.concatenate([x3, d4], axis=-1), params["up_rrcnn4"], 256)
    d3 = up_conv_block(d4, params["up3"], 128)
    d3 = rrcnn_block(jnp.concatenate([x2, d3], axis=-1), params["up_rrcnn3"], 128)
    d2 = up_conv_block(d3, params["up2"], 64)
    d2 = rrcnn_block(jnp.concatenate([x1, d2], axis=-1), params["up_rrcnn2"], 64)

    d1 = conv1x1(d2, params["final"], 1, relu=False, out_dtype=jnp.float32)
    return jnp.transpose(d1, (0, 4, 1, 2, 3))                          # -> NCDHW


# ----------------------------------------------------------------------------
# Parameter prep: BN fold, kw fold, channel padding, bf16 cast (done ONCE here)
# ----------------------------------------------------------------------------
def _prep_conv3(w, b, gamma, beta, mean, var, eps=1e-5):
    """(Cout,Cin,3,3,3) + BN -> {'w': (9, pad(3*Cin), pad(Cout)) bf16,
                                 'b': (1, pad(Cout)) f32}."""
    scale = gamma * jax.lax.rsqrt(var + eps)
    w = w * scale[:, None, None, None, None]
    b = (b - mean) * scale + beta

    cout, cin = w.shape[0], w.shape[1]
    # tap t = kd*3 + kh ; reduction index = kw*cin + c  (matches the activation
    # layout produced by conv3x3's kw concat).
    wt = jnp.transpose(w, (2, 3, 4, 1, 0)).reshape(9, 3 * cin, cout)

    cin_p = max(_round_up(3 * cin, 128), 128)
    cout_p = max(_round_up(cout, 128), 128)
    wt = jnp.pad(wt, ((0, 0), (0, cin_p - 3 * cin),
                      (0, cout_p - cout))).astype(jnp.bfloat16)
    bp = jnp.pad(b.astype(jnp.float32), (0, cout_p - cout)).reshape(1, cout_p)
    return {"w": wt, "b": bp}


def _prep_conv1(w, b):
    """(Cout,Cin,1,1,1) -> {'w': (1, pad(Cin), pad(Cout)) bf16, 'b': (1,pad) f32}."""
    cout, cin = w.shape[0], w.shape[1]
    wt = jnp.transpose(w.reshape(cout, cin), (1, 0)).reshape(1, cin, cout)
    cin_p = max(_round_up(cin, 128), 128)
    cout_p = max(_round_up(cout, 128), 128)
    wt = jnp.pad(wt, ((0, 0), (0, cin_p - cin),
                      (0, cout_p - cout))).astype(jnp.bfloat16)
    bp = jnp.pad(b.astype(jnp.float32), (0, cout_p - cout)).reshape(1, cout_p)
    return {"w": wt, "b": bp}


def init_params(key):
    keys = iter(jax.random.split(key, 512))

    def nk_():
        return next(keys)

    def conv_w(cin, cout, k):
        s = 1.0 / math.sqrt(cin * k ** 3)
        w = jax.random.uniform(nk_(), (cout, cin, k, k, k), jnp.float32, -s, s)
        b = jax.random.uniform(nk_(), (cout,), jnp.float32, -s, s)
        return w, b

    def conv_bn_relu(cin, cout):
        w, b = conv_w(cin, cout, 3)
        gamma = 1.0 + 0.1 * jax.random.normal(nk_(), (cout,), jnp.float32)
        beta = 0.1 * jax.random.normal(nk_(), (cout,), jnp.float32)
        mean = 0.1 * jax.random.normal(nk_(), (cout,), jnp.float32)
        var = jax.random.uniform(nk_(), (cout,), jnp.float32, 0.5, 1.5)
        return _prep_conv3(w, b, gamma, beta, mean, var)

    def conv1x1_p(cin, cout):
        w, b = conv_w(cin, cout, 1)
        return _prep_conv1(w, b)

    def rrcnn_p(cin, cout):
        return {"c1x1": conv1x1_p(cin, cout),
                "rec1": conv_bn_relu(cout, cout),
                "rec2": conv_bn_relu(cout, cout)}

    return {
        "rrcnn1": rrcnn_p(1, 64),
        "rrcnn2": rrcnn_p(64, 128),
        "rrcnn3": rrcnn_p(128, 256),
        "rrcnn4": rrcnn_p(256, 512),
        "rrcnn5": rrcnn_p(512, 1024),
        "up5": conv_bn_relu(1024, 512),
        "up_rrcnn5": rrcnn_p(1024, 512),
        "up4": conv_bn_relu(512, 256),
        "up_rrcnn4": rrcnn_p(512, 256),
        "up3": conv_bn_relu(256, 128),
        "up_rrcnn3": rrcnn_p(256, 128),
        "up2": conv_bn_relu(128, 64),
        "up_rrcnn2": rrcnn_p(128, 64),
        "final": conv1x1_p(64, 1),
    }


# ----------------------------------------------------------------------------
def _self_check_conv(key):
    """Validate the fused conv GEMM against a pure-JAX shifted-window reference."""
    k1, k2, k3 = jax.random.split(key, 3)
    N, D, H, W, cin, cout = 1, 4, 4, 4, 8, 16
    x = jax.random.normal(k1, (N, D, H, W, cin), jnp.float32)
    s = 1.0 / math.sqrt(cin * 27)
    w = jax.random.uniform(k2, (cout, cin, 3, 3, 3), jnp.float32, -s, s)
    b = jax.random.uniform(k3, (cout,), jnp.float32, -s, s)

    p = _prep_conv3(w, b,
                    jnp.ones((cout,), jnp.float32), jnp.zeros((cout,), jnp.float32),
                    jnp.zeros((cout,), jnp.float32), jnp.ones((cout,), jnp.float32))
    y = conv3x3(x.astype(jnp.bfloat16), p, cout, relu=False).astype(jnp.float32)

    xp = jnp.pad(x, ((0, 0), (1, 1), (1, 1), (1, 1), (0, 0)))
    ref = jnp.zeros((N, D, H, W, cout), jnp.float32)
    for kd in range(3):
        for kh in range(3):
            for kw in range(3):
                ref = ref + jnp.einsum(
                    "ndhwc,oc->ndhwo",
                    xp[:, kd:kd + D, kh:kh + H, kw:kw + W, :],
                    w[:, :, kd, kh, kw])
    ref = ref + b
    err = float(jnp.max(jnp.abs(y - ref)))
    assert err < 5e-2, f"conv self-check failed, max abs err = {err}"


if __name__ == "__main__":
    key = jax.random.PRNGKey(0)
    pkey, xkey, ckey = jax.random.split(key, 3)

    _self_check_conv(ckey)                      # cheap correctness gate

    params = init_params(pkey)
    # batch=1, in_channels=1, spatial=16 (smallest consistent with 4 poolings)
    x = jax.random.normal(xkey, (1, 1, 16, 16, 16), jnp.float32)

    fwd = jax.jit(r2u_net_forward)
    y = jax.block_until_ready(fwd(x, params))

    assert y.shape == (1, 1, 16, 16, 16), y.shape
    assert bool(jnp.all(jnp.isfinite(y)))
    print("KERNEL_OK")
</pallas_src>

<mosaic_0001>
module attributes {stable_mosaic.version = 11 : i64} {
  func.func @_conv_gemm_kernel(%arg0: i32, %arg1: i32, %arg2: i32, %arg3: memref<400x128xbf16, #tpu.memory_space<vmem>>, %arg4: memref<9x128x128xbf16, #tpu.memory_space<vmem>>, %arg5: memref<1x128xf32, #tpu.memory_space<vmem>>, %arg6: memref<288x128xbf16, #tpu.memory_space<vmem>>, %arg7: memref<288x128xf32, #tpu.memory_space<vmem>>) attributes {dimension_semantics = [#tpu.dimension_semantics<parallel>, #tpu.dimension_semantics<parallel>, #tpu.dimension_semantics<arbitrary>], iteration_bounds = array<i64: 1, 1, 1>, scalar_prefetch = 0 : i64, scratch_operands = 1 : i64, tpu.core_type = #tpu.core_type<tc>, window_params = [{transform_indices = @transform_0, window_bounds = array<i64: 400, 128>}, {transform_indices = @transform_1, window_bounds = array<i64: 9, 128, 128>}, {transform_indices = @transform_2, window_bounds = array<i64: 1, 128>}, {transform_indices = @transform_3, window_bounds = array<i64: 288, 128>}]} {
    %c0 = arith.constant 0 : index
    %c0_0 = arith.constant 0 : index
    %0 = vector.load %arg3[%c0, %c0_0] : memref<400x128xbf16, #tpu.memory_space<vmem>>, vector<288x128xbf16>
    %c0_1 = arith.constant 0 : index
    %c0_2 = arith.constant 0 : index
    %c0_3 = arith.constant 0 : index
    %1 = vector.load %arg4[%c0_1, %c0_2, %c0_3] : memref<9x128x128xbf16, #tpu.memory_space<vmem>>, vector<1x128x128xbf16>
    %2 = vector.shape_cast %1 : vector<1x128x128xbf16> to vector<128x128xbf16>
    %cst = arith.constant dense<0.000000e+00> : vector<288x128xf32>
    %3 = tpu.matmul %0, %2, %cst {dimension_numbers = #tpu.dot_dimension_numbers<[1], [0], [0], [1], [0, 0, 1, 1], [], []>} : vector<288x128xbf16>, vector<128x128xbf16>, vector<288x128xf32> -> vector<288x128xf32>
    %c8 = arith.constant 8 : index
    %c0_4 = arith.constant 0 : index
    %4 = vector.load %arg3[%c8, %c0_4] : memref<400x128xbf16, #tpu.memory_space<vmem>>, vector<288x128xbf16>
    %c1 = arith.constant 1 : index
    %c0_5 = arith.constant 0 : index
    %c0_6 = arith.constant 0 : index
    %5 = vector.load %arg4[%c1, %c0_5, %c0_6] : memref<9x128x128xbf16, #tpu.memory_space<vmem>>, vector<1x128x128xbf16>
    %6 = vector.shape_cast %5 : vector<1x128x128xbf16> to vector<128x128xbf16>
    %cst_7 = arith.constant dense<0.000000e+00> : vector<288x128xf32>
    %7 = tpu.matmul %4, %6, %cst_7 {dimension_numbers = #tpu.dot_dimension_numbers<[1], [0], [0], [1], [0, 0, 1, 1], [], []>} : vector<288x128xbf16>, vector<128x128xbf16>, vector<288x128xf32> -> vector<288x128xf32>
    %8 = arith.addf %3, %7 : vector<288x128xf32>
    %c16 = arith.constant 16 : index
    %c0_8 = arith.constant 0 : index
    %9 = vector.load %arg3[%c16, %c0_8] : memref<400x128xbf16, #tpu.memory_space<vmem>>, vector<288x128xbf16>
    %c2 = arith.constant 2 : index
    %c0_9 = arith.constant 0 : index
    %c0_10 = arith.constant 0 : index
    %10 = vector.load %arg4[%c2, %c0_9, %c0_10] : memref<9x128x128xbf16, #tpu.memory_space<vmem>>, vector<1x128x128xbf16>
    %11 = vector.shape_cast %10 : vector<1x128x128xbf16> to vector<128x128xbf16>
    %cst_11 = arith.constant dense<0.000000e+00> : vector<288x128xf32>
    %12 = tpu.matmul %9, %11, %cst_11 {dimension_numbers = #tpu.dot_dimension_numbers<[1], [0], [0], [1], [0, 0, 1, 1], [], []>} : vector<288x128xbf16>, vector<128x128xbf16>, vector<288x128xf32> -> vector<288x128xf32>
    %13 = arith.addf %8, %12 : vector<288x128xf32>
    %c48 = arith.constant 48 : index
    %c0_12 = arith.constant 0 : index
    %14 = vector.load %arg3[%c48, %c0_12] : memref<400x128xbf16, #tpu.memory_space<vmem>>, vector<288x128xbf16>
    %c3 = arith.constant 3 : index
    %c0_13 = arith.constant 0 : index
    %c0_14 = arith.constant 0 : index
    %15 = vector.load %arg4[%c3, %c0_13, %c0_14] : memref<9x128x128xbf16, #tpu.memory_space<vmem>>, vector<1x128x128xbf16>
    %16 = vector.shape_cast %15 : vector<1x128x128xbf16> to vector<128x128xbf16>
    %cst_15 = arith.constant dense<0.000000e+00> : vector<288x128xf32>
    %17 = tpu.matmul %14, %16, %cst_15 {dimension_numbers = #tpu.dot_dimension_numbers<[1], [0], [0], [1], [0, 0, 1, 1], [], []>} : vector<288x128xbf16>, vector<128x128xbf16>, vector<288x128xf32> -> vector<288x128xf32>
    %18 = arith.addf %13, %17 : vector<288x128xf32>
    %c56 = arith.constant 56 : index
    %c0_16 = arith.constant 0 : index
    %19 = vector.load %arg3[%c56, %c0_16] : memref<400x128xbf16, #tpu.memory_space<vmem>>, vector<288x128xbf16>
    %c4 = arith.constant 4 : index
    %c0_17 = arith.constant 0 : index
    %c0_18 = arith.constant 0 : index
    %20 = vector.load %arg4[%c4, %c0_17, %c0_18] : memref<9x128x128xbf16, #tpu.memory_space<vmem>>, vector<1x128x128xbf16>
    %21 = vector.shape_cast %20 : vector<1x128x128xbf16> to vector<128x128xbf16>
    %cst_19 = arith.constant dense<0.000000e+00> : vector<288x128xf32>
    %22 = tpu.matmul %19, %21, %cst_19 {dimension_numbers = #tpu.dot_dimension_numbers<[1], [0], [0], [1], [0, 0, 1, 1], [], []>} : vector<288x128xbf16>, vector<128x128xbf16>, vector<288x128xf32> -> vector<288x128xf32>
    %23 = arith.addf %18, %22 : vector<288x128xf32>
    %c64 = arith.constant 64 : index
    %c0_20 = arith.constant 0 : index
    %24 = vector.load %arg3[%c64, %c0_20] : memref<400x128xbf16, #tpu.memory_space<vmem>>, vector<288x128xbf16>
    %c5 = arith.constant 5 : index
    %c0_21 = arith.constant 0 : index
    %c0_22 = arith.constant 0 : index
    %25 = vector.load %arg4[%c5, %c0_21, %c0_22] : memref<9x128x128xbf16, #tpu.memory_space<vmem>>, vector<1x128x128xbf16>
    %26 = vector.shape_cast %25 : vector<1x128x128xbf16> to vector<128x128xbf16>
    %cst_23 = arith.constant dense<0.000000e+00> : vector<288x128xf32>
    %27 = tpu.matmul %24, %26, %cst_23 {dimension_numbers = #tpu.dot_dimension_numbers<[1], [0], [0], [1], [0, 0, 1, 1], [], []>} : vector<288x128xbf16>, vector<128x128xbf16>, vector<288x128xf32> -> vector<288x128xf32>
    %28 = arith.addf %23, %27 : vector<288x128xf32>
    %c96 = arith.constant 96 : index
    %c0_24 = arith.constant 0 : index
    %29 = vector.load %arg3[%c96, %c0_24] : memref<400x128xbf16, #tpu.memory_space<vmem>>, vector<288x128xbf16>
    %c6 = arith.constant 6 : index
    %c0_25 = arith.constant 0 : index
    %c0_26 = arith.constant 0 : index
    %30 = vector.load %arg4[%c6, %c0_25, %c0_26] : memref<9x128x128xbf16, #tpu.memory_space<vmem>>, vector<1x128x128xbf16>
    %31 = vector.shape_cast %30 : vector<1x128x128xbf16> to vector<128x128xbf16>
    %cst_27 = arith.constant dense<0.000000e+00> : vector<288x128xf32>
    %32 = tpu.matmul %29, %31, %cst_27 {dimension_numbers = #tpu.dot_dimension_numbers<[1], [0], [0], [1], [0, 0, 1, 1], [], []>} : vector<288x128xbf16>, vector<128x128xbf16>, vector<288x128xf32> -> vector<288x128xf32>
    %33 = arith.addf %28, %32 : vector<288x128xf32>
    %c104 = arith.constant 104 : index
    %c0_28 = arith.constant 0 : index
    %34 = vector.load %arg3[%c104, %c0_28] : memref<400x128xbf16, #tpu.memory_space<vmem>>, vector<288x128xbf16>
    %c7 = arith.constant 7 : index
    %c0_29 = arith.constant 0 : index
    %c0_30 = arith.constant 0 : index
    %35 = vector.load %arg4[%c7, %c0_29, %c0_30] : memref<9x128x128xbf16, #tpu.memory_space<vmem>>, vector<1x128x128xbf16>
    %36 = vector.shape_cast %35 : vector<1x128x128xbf16> to vector<128x128xbf16>
    %cst_31 = arith.constant dense<0.000000e+00> : vector<288x128xf32>
    %37 = tpu.matmul %34, %36, %cst_31 {dimension_numbers = #tpu.dot_dimension_numbers<[1], [0], [0], [1], [0, 0, 1, 1], [], []>} : vector<288x128xbf16>, vector<128x128xbf16>, vector<288x128xf32> -> vector<288x128xf32>
    %38 = arith.addf %33, %37 : vector<288x128xf32>
    %c112 = arith.constant 112 : index
    %c0_32 = arith.constant 0 : index
    %39 = vector.load %arg3[%c112, %c0_32] : memref<400x128xbf16, #tpu.memory_space<vmem>>, vector<288x128xbf16>
    %c8_33 = arith.constant 8 : index
    %c0_34 = arith.constant 0 : index
    %c0_35 = arith.constant 0 : index
    %40 = vector.load %arg4[%c8_33, %c0_34, %c0_35] : memref<9x128x128xbf16, #tpu.memory_space<vmem>>, vector<1x128x128xbf16>
    %41 = vector.shape_cast %40 : vector<1x128x128xbf16> to vector<128x128xbf16>
    %cst_36 = arith.constant dense<0.000000e+00> : vector<288x128xf32>
    %42 = tpu.matmul %39, %41, %cst_36 {dimension_numbers = #tpu.dot_dimension_numbers<[1], [0], [0], [1], [0, 0, 1, 1], [], []>} : vector<288x128xbf16>, vector<128x128xbf16>, vector<288x128xf32> -> vector<288x128xf32>
    %43 = arith.addf %38, %42 : vector<288x128xf32>
    %c0_37 = arith.constant 0 : index
    %c0_38 = arith.constant 0 : index
    %44 = vector.load %arg5[%c0_37, %c0_38] : memref<1x128xf32, #tpu.memory_space<vmem>>, vector<1x128xf32>
    %45 = vector.broadcast %44 : vector<1x128xf32> to vector<288x128xf32>
    %46 = arith.addf %43, %45 : vector<288x128xf32>
    %47 = arith.truncf %46 : vector<288x128xf32> to vector<288x128xbf16>
    %c0_39 = arith.constant 0 : index
    %c0_40 = arith.constant 0 : index
    %48 = vector.load %arg6[%c0_39, %c0_40] : memref<288x128xbf16, #tpu.memory_space<vmem>>, vector<288x128xbf16>
    tpu.vector_store %arg6[%c0_39, %c0_40], %47 {strides = array<i32>} : memref<288x128xbf16, #tpu.memory_space<vmem>>, vector<288x128xbf16>,
    return
  }
  func.func @transform_0(%arg0: i32, %arg1: i32, %arg2: i32) -> (i32, i32) {
    %c0_i32 = arith.constant 0 : i32
    %c0_i32_0 = arith.constant 0 : i32
    return %c0_i32, %arg2 : i32, i32
  }
  func.func @transform_1(%arg0: i32, %arg1: i32, %arg2: i32) -> (i32, i32, i32) {
    %c0_i32 = arith.constant 0 : i32
    %c0_i32_0 = arith.constant 0 : i32
    return %c0_i32, %arg2, %arg1 : i32, i32, i32
  }
  func.func @transform_2(%arg0: i32, %arg1: i32, %arg2: i32) -> (i32, i32) {
    %c0_i32 = arith.constant 0 : i32
    %c0_i32_0 = arith.constant 0 : i32
    return %c0_i32, %arg1 : i32, i32
  }
  func.func @transform_3(%arg0: i32, %arg1: i32, %arg2: i32) -> (i32, i32) {
    %c0_i32 = arith.constant 0 : i32
    return %arg0, %arg1 : i32, i32
  }
}

</mosaic_0001>

<bundles_post_ra>
// kernel: tpu_custom_call.1
= control target key start
LH: loop header
LB: loop body
LE: loop exit
PB: predicated region body
PF: predicated region fallthrough
CT: control target
= control target key end

     0   :  { %8 = vsyncpa [#allocation4], 0  ;;  %s5962_s0 = inlined_call_operand.hbm [shape: bf16[400,128], index: 0, kind: input, shape index: {}]   ;;  %s5963_s1 = inlined_call_operand.hbm [shape: bf16[9,128,128], index: 1, kind: input, shape index: {}]   ;;  %s5964_s2 = inlined_call_operand.vmem [shape: f32[1,128], index: 2, kind: input, shape index: {}]   ;;  %s5965_s3 = inlined_call_operand.hbm [shape: bf16[288,128], index: 3, kind: output, shape index: {}]  }
   0x1   :  { %9 = vsyncpa [#allocation7], 0 }
   0x2   :  { %10 = vsyncpa [#allocation5], 0  ;;  %s5644_s12 = smov [#allocation3]   ;;  %s5572_s16 = scalar_lea.hbm %s5962_s0, 3200 }
   0x3   :  { %s16_s13 = sshll.u32 %s5644_s12, 4  ;;  %p5573_p0 = scmp.ne.s32.totalorder %s5962_s0, %s5572_s16  ;;  %s17_s13 = int_to_ptr.vmem [resolvable:$true] %s16_s13 }
   0x4   :  { %p5576_p1 = scmp.lt.u32.totalorder %s5572_s16, %s5962_s0 }
   0x6   :  { %p5578_p2 = pnand %p5576_p1, %p5573_p0 }
   0x8   :  { %5581 = shalt.err (!%p5578_p2)
}
   0x9   :  { %s5582_s21 = scalar_lea.vmem %s17_s13, 3200  ;;  %p5587_p4 = scmp.lt.s32.totalorder %s17_s13, %s17_s13 }
   0xa   :  { %p5583_p3 = scmp.ne.s32.totalorder %s17_s13, %s5582_s21  ;;  %p5588_p5 = scmp.lt.s32.totalorder %s5582_s21, %s5582_s21 }
   0xc   :  { %p5589_p6 = por %p5588_p5, %p5587_p4 }
   0xe   :  { %p5590_p7 = pnand %p5589_p6, %p5583_p3 }
  0x10   :  { %5593 = shalt.err (!%p5590_p7)
}
  0x11   :  { %s5645_s22 = smov 64   ;;  %s5646_s23 = smov 4  }
  0x12   :  { %22 = dma.hbm_to_vmem [thread:$0]  %s5962_s0, 3200, %s17_s13, [#allocation4], %s5645_s22, %s5645_s22, %s5646_s23  }
  0x13   :  { %s5647_s26 = smov [#allocation6]   ;;  %s5594_s30 = scalar_lea.hbm %s5963_s1, 9216 }
  0x14   :  { %s28_s27 = sshll.u32 %s5647_s26, 4  ;;  %p5595_p8 = scmp.ne.s32.totalorder %s5963_s1, %s5594_s30  ;;  %s29_s27 = int_to_ptr.vmem [resolvable:$true] %s28_s27 }
  0x15   :  { %p5598_p9 = scmp.lt.u32.totalorder %s5594_s30, %s5963_s1 }
  0x17   :  { %p5600_p10 = pnand %p5598_p9, %p5595_p8 }
  0x19   :  { %5603 = shalt.err (!%p5600_p10)
}
  0x1a   :  { %s5604_s8 = scalar_lea.vmem %s29_s27, 9216  ;;  %p5609_p12 = scmp.lt.s32.totalorder %s29_s27, %s29_s27 }
  0x1b   :  { %p5605_p11 = scmp.ne.s32.totalorder %s29_s27, %s5604_s8  ;;  %p5610_p13 = scmp.lt.s32.totalorder %s5604_s8, %s5604_s8 }
  0x1d   :  { %p5611_p0 = por %p5610_p13, %p5609_p12 }
  0x1f   :  { %p5612_p1 = pnand %p5611_p0, %p5605_p11 }
  0x21   :  { %5615 = shalt.err (!%p5612_p1)
}
  0x22   :  { %34 = dma.hbm_to_vmem [thread:$0]  %s5963_s1, 9216, %s29_s27, [#allocation7], %s5645_s22, %s5645_s22, %s5646_s23  }
  0x23   :  { %5638 = dma.done.wait [#allocation4], 3200  }
  0x24   :  { %5639 = vsyncadd [#allocation4], 4294964096 }
  0x25   :  { %5640 = dma.done.wait [#allocation7], 9216  }
  0x26   :  { %5641 = vsyncadd [#allocation7], 4294958080  ;;  %v5330_v0 = vld [vmem:[#allocation6 + $0x40] sm:$0xff]   ;;  %v5332_v2 = vld [vmem:[#allocation6 + $0x48] sm:$0xff]  }
  0x27   :  { %v5331_v1 = vld [vmem:[#allocation6 + $0x100] sm:$0xff]   ;;  %4553 = vmatprep.subr.bf16.mxu1 %v5330_v0  ;;  %v5333_v3 = vld [vmem:[#allocation6 + $0x108] sm:$0xff]   ;;  %v5334_v4 = vld [vmem:[#allocation6 + $0x50] sm:$0xff]  }
  0x28   :  { %4761 = vmatprep.subr.bf16.mxu0 %v5331_v1  ;;  %4554 = vmatpush3.bf16.msra.mxu1 %v5330_v0  ;;  %v5335_v5 = vld [vmem:[#allocation6 + $0x110] sm:$0xff]   ;;  %v5336_v6 = vld [vmem:[#allocation6 + $0x58] sm:$0xff]   ;;  %v5338_v8 = vld [vmem:[#allocation6 + $0x60] sm:$0xff]  }
  0x29   :  { %4762 = vmatpush3.bf16.msra.mxu0 %v5331_v1  ;;  %4555 = vmatprep.subr.bf16.mxu1 %v5332_v2  ;;  %v5337_v7 = vld [vmem:[#allocation6 + $0x118] sm:$0xff]   ;;  %v5339_v9 = vld [vmem:[#allocation6 + $0x120] sm:$0xff]   ;;  %v5340_v10 = vld [vmem:[#allocation6 + $0x68] sm:$0xff]  }
  0x2a   :  { %4763 = vmatprep.subr.bf16.mxu0 %v5333_v3  ;;  %v5341_v11 = vld [vmem:[#allocation6 + $0x128] sm:$0xff]   ;;  %v5699_v12 = vld [vmem:[#allocation3 + $0x4] sm:$0xf]  ;;  %v5701_v13 = vld [vmem:[#allocation3 + $0x8] sm:$0xf] }
  0x2b   :  { %v5703_v14 = vld [vmem:[#allocation3 + $0xc] sm:$0xf]  ;;  %v3905_v15 = vcombine.low %v5699_v12, %v5701_v13  ;;  %v5349_v17 = vld [vmem:[#allocation3 + $0x1c] sm:$0xff]   ;;  %v5709_v20 = vld [vmem:[#allocation3 + $0x10] sm:$0xf] }
  0x2c   :  { %4556 = vmatpush3.bf16.msra.mxu1 %v5332_v2  ;;  %v3932_v16 = vcombine.low %v5701_v13, %v5703_v14  ;;  %v5342_v18 = vld [vmem:[#allocation6 + $0x70] sm:$0xff]   ;;  %4777 = vmatprep.mubr.bf16.mxu0 %v5349_v17  ;;  %v5711_v21 = vld [vmem:[#allocation3 + $0x14] sm:$0xf]  ;;  %v5344_v23 = vld [vmem:[#allocation6 + $0x78] sm:$0xff]   ;;  %v3906_v32 = vcombine.low %v5703_v14, %v5709_v20 }
  0x2d   :  { %4764 = vmatpush3.bf16.msra.mxu0 %v5333_v3  ;;  %4557 = vmatprep.subr.bf16.mxu1 %v5334_v4  ;;  %v5343_v19 = vld [vmem:[#allocation6 + $0x130] sm:$0xff]   ;;  %v3933_v22 = vcombine.low %v5709_v20, %v5711_v21  ;;  %v5345_v26 = vld [vmem:[#allocation6 + $0x138] sm:$0xff]   ;;  %v5351_v28 = vld [vmem:[#allocation6] sm:$0xff]  }
  0x2e   :  { %4765 = vmatprep.subr.bf16.mxu0 %v5335_v5  ;;  %4569 = vmatprep.mubr.bf16.mxu1 %v3905_v15  ;;  %v5715_v24 = vld [vmem:[#allocation3 + $0x18] sm:$0xf]  ;;  %v5717_v25 = vld [vmem:[#allocation3 + $0x1c] sm:$0xf]  ;;  %v5353_v29 = vld [vmem:[#allocation6 + $0x140] sm:$0xff]  }
  0x2f   :  { %v3934_v27 = vcombine.low %v5715_v24, %v5717_v25  ;;  %v5721_v30 = vld [vmem:[#allocation3 + $0x20] sm:$0xf]  ;;  %v5723_v31 = vld [vmem:[#allocation3 + $0x24] sm:$0xf]  ;;  %v5727_v33 = vld [vmem:[#allocation3 + $0x28] sm:$0xf]  ;;  %v3907_v39 = vcombine.low %v5711_v21, %v5715_v24 }
  0x30   :  { %4558 = vmatpush3.bf16.msra.mxu1 %v5334_v4  ;;  %v5729_v34 = vld [vmem:[#allocation3 + $0x2c] sm:$0xf]  ;;  %v3935_v35 = vcombine.low %v5721_v30, %v5723_v31  ;;  %v5352_v36 = vld [vmem:[#allocation3 + $0x24] sm:$0xff]   ;;  %v5354_v38 = vld [vmem:[#allocation6 + $0x148] sm:$0xff]   ;;  %v3908_v49 = vcombine.low %v5717_v25, %v5721_v30  ;;  %v3909_v53 = vcombine.low %v5723_v31, %v5727_v33 }
  0x31   :  { %4766 = vmatpush3.bf16.msra.mxu0 %v5335_v5  ;;  %4559 = vmatprep.subr.bf16.mxu1 %v5336_v6  ;;  %v3936_v37 = vcombine.low %v5727_v33, %v5729_v34  ;;  %v5356_v40 = vld [vmem:[#allocation3 + $0x2c] sm:$0xff]   ;;  %v5359_v42 = vld [vmem:[#allocation6 + $0x150] sm:$0xff]   ;;  %v5739_v44 = vld [vmem:[#allocation3 + $0x34] sm:$0xf] }
  0x32   :  { %4767 = vmatprep.subr.bf16.mxu0 %v5337_v7  ;;  %v5360_v41 = vld [vmem:[#allocation6 + $0x8] sm:$0xff]   ;;  %v5367_v45 = vld [vmem:[#allocation6 + $0x10] sm:$0xff]   ;;  %v5361_v52 = vld [vmem:[#allocation6 + $0x158] sm:$0xff]  }
  0x33   :  { %v5737_v43 = vld [vmem:[#allocation3 + $0x30] sm:$0xf]  ;;  %v5743_v47 = vld [vmem:[#allocation3 + $0x38] sm:$0xf]  ;;  %v5745_v48 = vld [vmem:[#allocation3 + $0x3c] sm:$0xf] }
  0x34   :  { %4560 = vmatpush3.bf16.msra.mxu1 %v5336_v6  ;;  %v3937_v46 = vcombine.low %v5737_v43, %v5739_v44  ;;  %v5358_v50 = vld [vmem:[#allocation3 + $0x34] sm:$0xff]   ;;  %v3938_v51 = vcombine.low %v5743_v47, %v5745_v48  ;;  %v5363_v54 = vld [vmem:[#allocation3 + $0x3c] sm:$0xff]   ;;  %v5755_v56 = vld [vmem:[#allocation3 + $0x44] sm:$0xf]  ;;  %v3910_v1 = vcombine.low %v5729_v34, %v5737_v43  ;;  %v3911_v4 = vcombine.low %v5739_v44, %v5743_v47 }
  0x35   :  { %4768 = vmatpush3.bf16.msra.mxu0 %v5337_v7  ;;  %4561 = vmatprep.subr.bf16.mxu1 %v5338_v8  ;;  %v5753_v55 = vld [vmem:[#allocation3 + $0x40] sm:$0xf]  ;;  %v5759_v59 = vld [vmem:[#allocation3 + $0x48] sm:$0xf]  ;;  %v5761_v60 = vld [vmem:[#allocation3 + $0x4c] sm:$0xf] }
  0x36   :  { %4769 = vmatprep.subr.bf16.mxu0 %v5339_v9  ;;  %v5374_v57 = vld [vmem:[#allocation6 + $0x18] sm:$0xff]   ;;  %v3939_v58 = vcombine.low %v5753_v55, %v5755_v56  ;;  %v5366_v61 = vld [vmem:[#allocation6 + $0x160] sm:$0xff]   ;;  %v3940_v62 = vcombine.low %v5759_v59, %v5761_v60  ;;  %v5765_v0 = vld [vmem:[#allocation3 + $0x50] sm:$0xf] }
  0x37   :  { %v5365_v63 = vld [vmem:[#allocation3 + $0x44] sm:$0xff]   ;;  %v5769_v3 = vld [vmem:[#allocation3 + $0x54] sm:$0xf]  ;;  %v5773_v5 = vld [vmem:[#allocation3 + $0x58] sm:$0xf] }
  0x38   :  { %4562 = vmatpush3.bf16.msra.mxu1 %v5338_v8  ;;  %v5380_v2 = vld [vmem:[#allocation6 + $0x20] sm:$0xff]   ;;  %v5775_v6 = vld [vmem:[#allocation3 + $0x5c] sm:$0xf]  ;;  %v3941_v7 = vcombine.low %v5765_v0, %v5769_v3  ;;  %v5386_v15 = vld [vmem:[#allocation6 + $0x28] sm:$0xff]  }
  0x39   :  { %4770 = vmatpush3.bf16.msra.mxu0 %v5339_v9  ;;  %4563 = vmatprep.subr.bf16.mxu1 %v5340_v10  ;;  %v5370_v8 = vld [vmem:[#allocation3 + $0x4c] sm:$0xff]   ;;  %v3942_v9 = vcombine.low %v5773_v5, %v5775_v6  ;;  %v5783_v17 = vld [vmem:[#allocation3 + $0x64] sm:$0xf]  ;;  %v5417_v14 = vld [vmem:[#allocation3 + $0x98] sm:$0xff]  }
  0x3a   :  { %4771 = vmatprep.subr.bf16.mxu0 %v5341_v11  ;;  %v5430_v13 = vld [vmem:[#allocation6 + $0xa0] sm:$0xff]   ;;  %v5436_v20 = vld [vmem:[#allocation6 + $0xa8] sm:$0xff]   ;;  %v5442_v21 = vld [vmem:[#allocation6 + $0xb0] sm:$0xff]  }
  0x3b   :  { %v5427_v24 = vld [vmem:[#allocation3 + $0x30] sm:$0xff]   ;;  %v5449_v25 = vld [vmem:[#allocation6 + $0xb8] sm:$0xff]   ;;  %v5429_v30 = vld [vmem:[#allocation3 + $0x38] sm:$0xff]  }
  0x3c   :  { %4564 = vmatpush3.bf16.msra.mxu1 %v5340_v10  ;;  %v5368_v10 = vld [vmem:[#allocation6 + $0x168] sm:$0xff]   ;;  %v5432_v31 = vld [vmem:[#allocation3 + $0x40] sm:$0xff]   ;;  %v5447_v34 = vld [vmem:[#allocation6 + $0x1d0] sm:$0xff]  }
  0x3d   :  { %4772 = vmatpush3.bf16.msra.mxu0 %v5341_v11  ;;  %4565 = vmatprep.subr.bf16.mxu1 %v5342_v18  ;;  %v5781_v11 = vld [vmem:[#allocation3 + $0x60] sm:$0xf]  ;;  %v5441_v33 = vld [vmem:[#allocation6 + $0x1c8] sm:$0xff]   ;;  %v5459_v44 = vld [vmem:[#allocation6 + $0x1e0] sm:$0xff]  }
  0x3e   :  { %4773 = vmatprep.subr.bf16.mxu0 %v5343_v19  ;;  %v5453_v43 = vld [vmem:[#allocation6 + $0x1d8] sm:$0xff]  }
  0x3f   :  { %v5444_v47 = vld [vmem:[#allocation3 + $0x60] sm:$0xff]  }
  0x40   :  { %4566 = vmatpush3.bf16.msra.mxu1 %v5342_v18  ;;  %v5373_v18 = vld [vmem:[#allocation6 + $0x170] sm:$0xff]  }
  0x41   :  { %4774 = vmatpush3.bf16.msra.mxu0 %v5343_v19  ;;  %4567 = vmatprep.subr.bf16.mxu1 %v5344_v23  ;;  %v3943_v19 = vcombine.low %v5781_v11, %v5783_v17 }
  0x42   :  { %4775 = vmatprep.subr.bf16.mxu0 %v5345_v26 }
  0x44   :  { %4568 = vmatpush3.bf16.msra.mxu1 %v5344_v23  ;;  %v5372_v23 = vld [vmem:[#allocation3 + $0x54] sm:$0xff]  }
  0x45   :  { %4776 = vmatpush3.bf16.msra.mxu0 %v5345_v26  ;;  %4605 = vmatprep.subr.bf16.mxu1 %v5351_v28  ;;  %v5787_v26 = vld [vmem:[#allocation3 + $0x68] sm:$0xf] }
  0x46   :  { %4813 = vmatprep.subr.bf16.mxu0 %v5353_v29 }
  0x47   :  { %4570 = vmatmul.mubr.bf16.vlgmr.msra.gmra.mrb[0].mxu1 %v3906_v32  ;;  %v5377_v32 = vld [vmem:[#allocation3 + $0x20] sm:$0xff]  }
  0x48   :  { %4778 = vmatmul.mubr.bf16.vlgmr.msra.gmra.mrb[0].mxu0 %v5352_v36  ;;  %4606 = vmatpush3.bf16.msra.mxu1 %v5351_v28  ;;  %v5789_v28 = vld [vmem:[#allocation3 + $0x6c] sm:$0xf] }
  0x49   :  { %4814 = vmatpush3.bf16.msra.mxu0 %v5353_v29  ;;  %4573 = vmatprep.mubr.bf16.mxu1 %v3907_v39  ;;  %v3912_v29 = vcombine.low %v5745_v48, %v5753_v55  ;;  %v3944_v36 = vcombine.low %v5787_v26, %v5789_v28  ;;  %v5797_v39 = vld [vmem:[#allocation3 + $0x70] sm:$0xf]  ;;  %v5446_v55 = vld [vmem:[#allocation3 + $0x68] sm:$0xff]  }
  0x4a   :  { %4815 = vmatprep.subr.bf16.mxu0 %v5354_v38  ;;  %4781 = vmatprep.mubr.bf16.mxu0 %v5356_v40  ;;  %v5392_v40 = vld [vmem:[#allocation6 + $0x30] sm:$0xff]   ;;  %v5465_v48 = vld [vmem:[#allocation6 + $0x1e8] sm:$0xff]  }
  0x4b   :  { %4607 = vmatprep.subr.bf16.mxu1 %v5360_v41 }
  0x4c   :  { %4608 = vmatpush3.bf16.msra.mxu1 %v5360_v41  ;;  %v5799_v41 = vld [vmem:[#allocation3 + $0x74] sm:$0xf] }
  0x4d   :  { %4816 = vmatpush3.bf16.msra.mxu0 %v5354_v38  ;;  %4609 = vmatprep.subr.bf16.mxu1 %v5367_v45  ;;  %v3913_v38 = vcombine.low %v5755_v56, %v5759_v59  ;;  %v5450_v56 = vld [vmem:[#allocation3 + $0x70] sm:$0xff]  }
  0x4e   :  { %4817 = vmatprep.subr.bf16.mxu0 %v5359_v42 }
  0x4f   :  { %4574 = vmatmul.mubr.bf16.gmra.mrb[4].mxu1 %v3908_v49  ;;  %v5803_v49 = vld [vmem:[#allocation3 + $0x78] sm:$0xf] }
  0x50   :  { %4782 = vmatmul.mubr.bf16.gmra.mrb[4].mxu0 %v5358_v50  ;;  %4577 = vmatprep.mubr.bf16.mxu1 %v3909_v53  ;;  %v5805_v50 = vld [vmem:[#allocation3 + $0x7c] sm:$0xf]  ;;  %v5385_v53 = vld [vmem:[#allocation6 + $0x180] sm:$0xff]  }
  0x51   :  { %4818 = vmatpush3.bf16.msra.mxu0 %v5359_v42  ;;  %4785 = vmatprep.mubr.bf16.mxu0 %v5363_v54  ;;  %v5375_v42 = vld [vmem:[#allocation6 + $0x178] sm:$0xff]   ;;  %v5379_v54 = vld [vmem:[#allocation3 + $0x28] sm:$0xff]   ;;  %v5966_v59 = vcombine.low %v5803_v49, %v5805_v50 }
  0x52   :  { %4819 = vmatprep.subr.bf16.mxu0 %v5361_v52  ;;  %4610 = vmatpush3.bf16.msra.mxu1 %v5367_v45  ;;  %v3945_v45 = vcombine.low %v5797_v39, %v5799_v41 }
  0x53   :  { %4611 = vmatprep.subr.bf16.mxu1 %v5374_v57 }
  0x55   :  { %4820 = vmatpush3.bf16.msra.mxu0 %v5361_v52  ;;  %v5404_v52 = vld [vmem:[#allocation3 + $0x70] sm:$0xff]  }
  0x56   :  { %4821 = vmatprep.subr.bf16.mxu0 %v5366_v61  ;;  %4612 = vmatpush3.bf16.msra.mxu1 %v5374_v57  ;;  %v5809_v57 = vld [vmem:[#allocation3 + $0x80] sm:$0xf] }
  0x57   :  { %4578 = vmatmul.mubr.bf16.gmra.mrb[8].mxu1 %v3910_v1  ;;  %4613 = vmatprep.subr.bf16.mxu1 %v5380_v2  ;;  %v5399_v1 = vld [vmem:[#allocation6 + $0x38] sm:$0xff]  }
  0x58   :  { %4786 = vmatmul.mubr.bf16.gmra.mrb[8].mxu0 %v5365_v63  ;;  %4581 = vmatprep.mubr.bf16.mxu1 %v3911_v4  ;;  %v3914_v63 = vcombine.low %v5761_v60, %v5765_v0  ;;  %v3915_v4 = vcombine.low %v5769_v3, %v5773_v5  ;;  %v5452_v0 = vld [vmem:[#allocation3 + $0x78] sm:$0xff]   ;;  %v5454_v3 = vld [vmem:[#allocation3 + $0x8] sm:$0xff]   ;;  %v5455_v5 = vld [vmem:[#allocation3 + $0x80] sm:$0xff]  }
  0x59   :  { %4822 = vmatpush3.bf16.msra.mxu0 %v5366_v61  ;;  %4789 = vmatprep.mubr.bf16.mxu0 %v5370_v8  ;;  %v5811_v61 = vld [vmem:[#allocation3 + $0x84] sm:$0xf]  ;;  %v5819_v8 = vld [vmem:[#allocation3 + $0x88] sm:$0xf] }
  0x5a   :  { %4823 = vmatprep.subr.bf16.mxu0 %v5368_v10  ;;  %4614 = vmatpush3.bf16.msra.mxu1 %v5380_v2  ;;  %v5402_v2 = vld [vmem:[#allocation3 + $0x68] sm:$0xff]   ;;  %v5967_v60 = vcombine.low %v5809_v57, %v5811_v61 }
  0x5b   :  { %4615 = vmatprep.subr.bf16.mxu1 %v5386_v15 }
  0x5d   :  { %4824 = vmatpush3.bf16.msra.mxu0 %v5368_v10  ;;  %v5821_v10 = vld [vmem:[#allocation3 + $0x8c] sm:$0xf] }
  0x5e   :  { %4825 = vmatprep.subr.bf16.mxu0 %v5373_v18  ;;  %4616 = vmatpush3.bf16.msra.mxu1 %v5386_v15  ;;  %v5382_v15 = vld [vmem:[#allocation3 + $0x30] sm:$0xff]  }
  0x5f   :  { %4582 = vmatmul.mubr.bf16.gmra.mrb[12].mxu1 %v3912_v29  ;;  %4617 = vmatprep.subr.bf16.mxu1 %v5392_v40  ;;  %v5405_v29 = vld [vmem:[#allocation6 + $0x80] sm:$0xff]  }
  0x60   :  { %4790 = vmatmul.mubr.bf16.gmra.mrb[12].mxu0 %v5372_v23  ;;  %4585 = vmatprep.mubr.bf16.mxu1 %v3913_v38  ;;  %v5391_v23 = vld [vmem:[#allocation6 + $0x188] sm:$0xff]   ;;  %v3916_v38 = vcombine.low %v5775_v6, %v5781_v11  ;;  %v5968_v6 = vcombine.low %v5819_v8, %v5821_v10  ;;  %v5460_v11 = vld [vmem:[#allocation3 + $0x18] sm:$0xff]  }
  0x61   :  { %4826 = vmatpush3.bf16.msra.mxu0 %v5373_v18  ;;  %4829 = vmatprep.mubr.bf16.mxu0 %v5377_v32  ;;  %v5397_v32 = vld [vmem:[#allocation6 + $0x190] sm:$0xff]   ;;  %v5388_v18 = vld [vmem:[#allocation3 + $0x40] sm:$0xff]  }
  0x62   :  { %4827 = vmatprep.subr.bf16.mxu0 %v5375_v42  ;;  %4618 = vmatpush3.bf16.msra.mxu1 %v5392_v40  ;;  %v5384_v40 = vld [vmem:[#allocation3 + $0x38] sm:$0xff]  }
  0x63   :  { %4619 = vmatprep.subr.bf16.mxu1 %v5399_v1 }
  0x65   :  { %4828 = vmatpush3.bf16.msra.mxu0 %v5375_v42  ;;  %v3917_v42 = vcombine.low %v5783_v17, %v5787_v26  ;;  %v5461_v17 = vld [vmem:[#allocation3 + $0x90] sm:$0xff]   ;;  %v5470_v26 = vld [vmem:[#allocation6 + $0xd0] sm:$0xff]  }
  0x66   :  { %4865 = vmatprep.subr.bf16.mxu0 %v5385_v53  ;;  %4620 = vmatpush3.bf16.msra.mxu1 %v5399_v1  ;;  %v5403_v1 = vld [vmem:[#allocation6 + $0x198] sm:$0xff]  }
  0x67   :  { %4586 = vmatmul.mubr.bf16.gmra.mrb[16].mxu1 %v3914_v63  ;;  %4657 = vmatprep.subr.bf16.mxu1 %v5405_v29  ;;  %v5390_v63 = vld [vmem:[#allocation3 + $0x48] sm:$0xff]  }
  0x68   :  { %4830 = vmatmul.mubr.bf16.vlgmr.msra.gmra.mrb[0].mxu0 %v5379_v54  ;;  %4589 = vmatprep.mubr.bf16.mxu1 %v3915_v4  ;;  %v3918_v54 = vcombine.low %v5789_v28, %v5797_v39  ;;  %v3919_v4 = vcombine.low %v5799_v41, %v5803_v49  ;;  %v5462_v28 = vld [vmem:[#allocation3 + $0x20] sm:$0xff]   ;;  %v5466_v39 = vld [vmem:[#allocation3 + $0x28] sm:$0xff]   ;;  %v5468_v49 = vld [vmem:[#allocation3 + $0x30] sm:$0xff]  }
  0x69   :  { %4833 = vmatprep.mubr.bf16.mxu0 %v5382_v15  ;;  %4866 = vmatpush3.bf16.msra.mxu0 %v5385_v53  ;;  %v5407_v53 = vld [vmem:[#allocation6 + $0x1a0] sm:$0xff]   ;;  %v5394_v15 = vld [vmem:[#allocation3 + $0x50] sm:$0xff]   ;;  %v5467_v41 = vld [vmem:[#allocation3 + $0xa0] sm:$0xff]  }
  0x6a   :  { %4867 = vmatprep.subr.bf16.mxu0 %v5391_v23 }
  0x6d   :  { %4868 = vmatpush3.bf16.msra.mxu0 %v5391_v23  ;;  %v5413_v23 = vld [vmem:[#allocation6 + $0x1a8] sm:$0xff]  }
  0x6e   :  { %4869 = vmatprep.subr.bf16.mxu0 %v5397_v32 }
  0x6f   :  { %4590 = vmatmul.mubr.bf16.gmra.mrb[20].mxu1 %v3916_v38  ;;  %v5396_v38 = vld [vmem:[#allocation3 + $0x58] sm:$0xff]  }
  0x70   :  { %4834 = vmatmul.mubr.bf16.gmra.mrb[4].mxu0 %v5384_v40  ;;  %4593 = vmatprep.mubr.bf16.mxu1 %v3917_v42  ;;  %v3921_v40 = vcombine.low %v5811_v61, %v5819_v8  ;;  %v5400_v42 = vld [vmem:[#allocation3 + $0x60] sm:$0xff]   ;;  %v5472_v61 = vld [vmem:[#allocation3 + $0x38] sm:$0xff]   ;;  %v5473_v8 = vld [vmem:[#allocation3 + $0xb0] sm:$0xff]  }
  0x71   :  { %4837 = vmatprep.mubr.bf16.mxu0 %v5388_v18  ;;  %4870 = vmatpush3.bf16.msra.mxu0 %v5397_v32  ;;  %v5419_v18 = vld [vmem:[#allocation6 + $0x1b0] sm:$0xff]   ;;  %v3920_v32 = vcombine.low %v5805_v50, %v5809_v57  ;;  %v5482_v50 = vld [vmem:[#allocation6 + $0xe0] sm:$0xff]  }
  0x72   :  { %4871 = vmatprep.subr.bf16.mxu0 %v5403_v1  ;;  %v5469_v57 = vld [vmem:[#allocation3 + $0xa8] sm:$0xff]  }
  0x75   :  { %4872 = vmatpush3.bf16.msra.mxu0 %v5403_v1  ;;  %v5425_v1 = vld [vmem:[#allocation6 + $0x1b8] sm:$0xff]  }
  0x76   :  { %4873 = vmatprep.subr.bf16.mxu0 %v5407_v53 }
  0x77   :  { %4594 = vmatmul.mubr.bf16.gmra.mrb[24].mxu1 %v3918_v54  ;;  %v96_v54 = vld [vmem:[#allocation3 + $0x90] sm:$0xf] }
  0x78   :  { %4838 = vmatmul.mubr.bf16.gmra.mrb[8].mxu0 %v5390_v63  ;;  %4597 = vmatprep.mubr.bf16.mxu1 %v3919_v4  ;;  %v44_v63 = vld [vmem:[#allocation3] sm:$0xf]  ;;  %v3922_v4 = vcombine.low %v5821_v10, %v96_v54  ;;  %v5488_v10 = vld [vmem:[#allocation6 + $0xe8] sm:$0xff]  }
  0x79   :  { %4841 = vmatprep.mubr.bf16.mxu0 %v5394_v15  ;;  %4874 = vmatpush3.bf16.msra.mxu0 %v5407_v53  ;;  %v5837_v53 = vld [vmem:[#allocation6 + $0x1c0] sm:$0xff]   ;;  %v3931_v15 = vcombine.low %v44_v63, %v5699_v12  ;;  %v5418_v12 = vld [vmem:[#allocation6 + $0x90] sm:$0xff]   ;;  %v5501_v63 = vld [vmem:[#allocation6 + $0xf8] sm:$0xff]  }
  0x7a   :  { %4875 = vmatprep.subr.bf16.mxu0 %v5413_v23  ;;  %v5479_v54 = vld [vmem:[#allocation3 + $0x34] sm:$0xff]  }
  0x7d   :  { %4876 = vmatpush3.bf16.msra.mxu0 %v5413_v23  ;;  %v5406_v23 = vld [vmem:[#allocation3 + $0x78] sm:$0xff]  }
  0x7e   :  { %4877 = vmatprep.subr.bf16.mxu0 %v5419_v18 }
  0x7f   :  { %4598 = vmatmul.mubr.bf16.gmra.mrb[28].mxu1 %v3920_v32  ;;  %v5409_v32 = vld [vmem:[#allocation3 + $0x80] sm:$0xff]  }
  0x80   :  { %4842 = vmatmul.mubr.bf16.gmra.mrb[12].mxu0 %v5396_v38  ;;  %4601 = vmatprep.mubr.bf16.mxu1 %v3921_v40  ;;  %v5412_v38 = vld [vmem:[#allocation6 + $0x88] sm:$0xff]   ;;  %v5475_v40 = vld [vmem:[#allocation3 + $0xb8] sm:$0xff]  }
  0x81   :  { %4845 = vmatprep.mubr.bf16.mxu0 %v5400_v42  ;;  %4878 = vmatpush3.bf16.msra.mxu0 %v5419_v18  ;;  %v5411_v18 = vld [vmem:[#allocation3 + $0x88] sm:$0xff]   ;;  %v5494_v42 = vld [vmem:[#allocation6 + $0xf0] sm:$0xff]  }
  0x82   :  { %4879 = vmatprep.subr.bf16.mxu0 %v5425_v1 }
  0x85   :  { %4880 = vmatpush3.bf16.msra.mxu0 %v5425_v1  ;;  %v5478_v1 = vld [vmem:[#allocation3 + $0x48] sm:$0xff]  }
  0x86   :  { %4917 = vmatprep.subr.bf16.mxu0 %v5837_v53 }
  0x87   :  { %4602 = vmatmul.mubr.bf16.gmra.mrb[32].mxu1 %v3922_v4  ;;  %v5481_v4 = vld [vmem:[#allocation3 + $0x3c] sm:$0xff]  }
  0x88   :  { %4846 = vmatmul.mubr.bf16.gmra.mrb[16].mxu0 %v5402_v2  ;;  %4621 = vmatprep.mubr.bf16.mxu1 %v3931_v15  ;;  %v5415_v2 = vld [vmem:[#allocation3 + $0x90] sm:$0xff]   ;;  %v5483_v15 = vld [vmem:[#allocation3 + $0x58] sm:$0xff]  }
  0x89   :  { %4849 = vmatprep.mubr.bf16.mxu0 %v5404_v52  ;;  %v5424_v52 = vld [vmem:[#allocation6 + $0x98] sm:$0xff]  }
  0x8f   :  { %4622 = vmatmul.mubr.bf16.vlgmr.msra.gmra.mrb[0].mxu1 %v3932_v16  ;;  %v5421_v16 = vld [vmem:[#allocation3 + $0xa0] sm:$0xff]  }
  0x90   :  { %4850 = vmatmul.mubr.bf16.gmra.mrb[20].mxu0 %v5406_v23  ;;  %4658 = vmatpush3.bf16.msra.mxu1 %v5405_v29  ;;  %v5474_v29 = vld [vmem:[#allocation3 + $0x40] sm:$0xff]  }
  0x91   :  { %4625 = vmatprep.mubr.bf16.mxu1 %v3933_v22  ;;  %4853 = vmatprep.mubr.bf16.mxu0 %v5409_v32  ;;  %v5423_v22 = vld [vmem:[#allocation3 + $0xa8] sm:$0xff]   ;;  %v5493_v32 = vld [vmem:[#allocation6 + $0x208] sm:$0xff]  }
  0x92   :  { %4659 = vmatprep.subr.bf16.mxu1 %v5412_v38  ;;  %v5484_v23 = vld [vmem:[#allocation3 + $0x44] sm:$0xff]  }
  0x94   :  { %4660 = vmatpush3.bf16.msra.mxu1 %v5412_v38  ;;  %v5901_v38 = vld [vmem:[#allocation6 + $0x100] sm:$0xff]  }
  0x95   :  { %4661 = vmatprep.subr.bf16.mxu1 %v5418_v12 }
  0x97   :  { %4626 = vmatmul.mubr.bf16.gmra.mrb[4].mxu1 %v3934_v27  ;;  %v5866_v27 = vld [vmem:[#allocation6 + $0xc0] sm:$0xff]  }
  0x98   :  { %4854 = vmatmul.mubr.bf16.gmra.mrb[24].mxu0 %v5411_v18  ;;  %4629 = vmatprep.mubr.bf16.mxu1 %v3935_v35  ;;  %v5434_v35 = vld [vmem:[#allocation3 + $0x48] sm:$0xff]   ;;  %v5485_v18 = vld [vmem:[#allocation3 + $0x60] sm:$0xff]  }
  0x99   :  { %4857 = vmatprep.mubr.bf16.mxu0 %v5415_v2  ;;  %4662 = vmatpush3.bf16.msra.mxu1 %v5418_v12  ;;  %v5499_v12 = vld [vmem:[#allocation6 + $0x210] sm:$0xff]   ;;  %v5486_v2 = vld [vmem:[#allocation3 + $0x4c] sm:$0xff]  }
  0x9a   :  { %4663 = vmatprep.subr.bf16.mxu1 %v5424_v52 }
  0x9d   :  { %4664 = vmatpush3.bf16.msra.mxu1 %v5424_v52  ;;  %v5489_v52 = vld [vmem:[#allocation3 + $0x68] sm:$0xff]  }
  0x9e   :  { %4665 = vmatprep.subr.bf16.mxu1 %v5430_v13 }
  0x9f   :  { %4630 = vmatmul.mubr.bf16.gmra.mrb[8].mxu1 %v3936_v37  ;;  %v5438_v37 = vld [vmem:[#allocation3 + $0x50] sm:$0xff]  }
  0xa0   :  { %4858 = vmatmul.mubr.bf16.gmra.mrb[28].mxu0 %v5417_v14  ;;  %4633 = vmatprep.mubr.bf16.mxu1 %v3937_v46  ;;  %v5440_v46 = vld [vmem:[#allocation3 + $0x58] sm:$0xff]   ;;  %v5505_v14 = vld [vmem:[#allocation6 + $0x218] sm:$0xff]  }
  0xa1   :  { %4861 = vmatprep.mubr.bf16.mxu0 %v5421_v16  ;;  %4666 = vmatpush3.bf16.msra.mxu1 %v5430_v13  ;;  %v5490_v13 = vld [vmem:[#allocation3 + $0x54] sm:$0xff]   ;;  %v5510_v16 = vld [vmem:[#allocation6 + $0x220] sm:$0xff]  }
  0xa2   :  { %4667 = vmatprep.subr.bf16.mxu1 %v5436_v20 }
  0xa5   :  { %4668 = vmatpush3.bf16.msra.mxu1 %v5436_v20  ;;  %v5491_v20 = vld [vmem:[#allocation3 + $0x70] sm:$0xff]  }
  0xa6   :  { %4669 = vmatprep.subr.bf16.mxu1 %v5442_v21 }
  0xa7   :  { %4634 = vmatmul.mubr.bf16.gmra.mrb[12].mxu1 %v3938_v51  ;;  %v5471_v51 = vld [vmem:[#allocation6 + $0x1f0] sm:$0xff]  }
  0xa8   :  { %4862 = vmatmul.mubr.bf16.gmra.mrb[32].mxu0 %v5423_v22  ;;  %4637 = vmatprep.mubr.bf16.mxu1 %v3939_v58  ;;  %v5477_v58 = vld [vmem:[#allocation6 + $0x1f8] sm:$0xff]   ;;  %v5495_v22 = vld [vmem:[#allocation3 + $0x78] sm:$0xff]  }
  0xa9   :  { %4881 = vmatprep.mubr.bf16.mxu0 %v5427_v24  ;;  %4670 = vmatpush3.bf16.msra.mxu1 %v5442_v21  ;;  %v5492_v21 = vld [vmem:[#allocation3 + $0x5c] sm:$0xff]   ;;  %v5496_v24 = vld [vmem:[#allocation3 + $0x64] sm:$0xff]  }
  0xaa   :  { %4671 = vmatprep.subr.bf16.mxu1 %v5449_v25 }
  0xad   :  { %4672 = vmatpush3.bf16.msra.mxu1 %v5449_v25  ;;  %v5515_v25 = vld [vmem:[#allocation6 + $0x228] sm:$0xff]  }
  0xae   :  { %4709 = vmatprep.subr.bf16.mxu1 %v5866_v27 }
  0xaf   :  { %4638 = vmatmul.mubr.bf16.gmra.mrb[16].mxu1 %v3940_v62  ;;  %v5894_v62 = vld [vmem:[#allocation6 + $0x200] sm:$0xff]  }
  0xb0   :  { %4882 = vmatmul.mubr.bf16.vlgmr.msra.gmra.mrb[0].mxu0 %v5429_v30  ;;  %4641 = vmatprep.mubr.bf16.mxu1 %v3941_v7  ;;  %v5456_v7 = vld [vmem:[#allocation3 + $0x10] sm:$0xff]   ;;  %v5497_v30 = vld [vmem:[#allocation3 + $0x80] sm:$0xff]  }
  0xb1   :  { %4885 = vmatprep.mubr.bf16.mxu0 %v5432_v31  ;;  %4918 = vmatpush3.bf16.msra.mxu0 %v5837_v53  ;;  %v5480_v53 = vld [vmem:[#allocation3 + $0x50] sm:$0xff]  }
  0xb2   :  { %4919 = vmatprep.subr.bf16.mxu0 %v5441_v33  ;;  %v5498_v31 = vld [vmem:[#allocation3 + $0x6c] sm:$0xff]  }
  0xb5   :  { %4920 = vmatpush3.bf16.msra.mxu0 %v5441_v33  ;;  %v5500_v33 = vld [vmem:[#allocation3 + $0x88] sm:$0xff]  }
  0xb6   :  { %4921 = vmatprep.subr.bf16.mxu0 %v5447_v34 }
  0xb7   :  { %4642 = vmatmul.mubr.bf16.gmra.mrb[20].mxu1 %v3942_v9  ;;  %v5458_v9 = vld [vmem:[#allocation3 + $0x88] sm:$0xff]  }
  0xb8   :  { %4886 = vmatmul.mubr.bf16.gmra.mrb[4].mxu0 %v5434_v35  ;;  %4645 = vmatprep.mubr.bf16.mxu1 %v3943_v19  ;;  %v5464_v19 = vld [vmem:[#allocation6 + $0xc8] sm:$0xff]   ;;  %v5525_v35 = vld [vmem:[#allocation6 + $0x238] sm:$0xff]  }
  0xb9   :  { %4889 = vmatprep.mubr.bf16.mxu0 %v5438_v37  ;;  %4922 = vmatpush3.bf16.msra.mxu0 %v5447_v34  ;;  %v5502_v34 = vld [vmem:[#allocation3 + $0x74] sm:$0xff]  }
  0xba   :  { %4923 = vmatprep.subr.bf16.mxu0 %v5453_v43  ;;  %v5503_v37 = vld [vmem:[#allocation3 + $0x90] sm:$0xff]  }
  0xbd   :  { %4924 = vmatpush3.bf16.msra.mxu0 %v5453_v43  ;;  %v5504_v43 = vld [vmem:[#allocation3 + $0x7c] sm:$0xff]  }
  0xbe   :  { %4925 = vmatprep.subr.bf16.mxu0 %v5459_v44 }
  0xbf   :  { %4646 = vmatmul.mubr.bf16.gmra.mrb[24].mxu1 %v3944_v36  ;;  %v5463_v36 = vld [vmem:[#allocation3 + $0x98] sm:$0xff]  }
  0xc0   :  { %4890 = vmatmul.mubr.bf16.gmra.mrb[8].mxu0 %v5440_v46  ;;  %4649 = vmatprep.mubr.bf16.mxu1 %v3945_v45  ;;  %v5476_v45 = vld [vmem:[#allocation6 + $0xd8] sm:$0xff]  }
  0xc1   :  { %4893 = vmatprep.mubr.bf16.mxu0 %v5444_v47  ;;  %4926 = vmatpush3.bf16.msra.mxu0 %v5459_v44  ;;  %v5506_v44 = vld [vmem:[#allocation3 + $0x18] sm:$0xff]   ;;  %v5507_v46 = vld [vmem:[#allocation3 + $0x84] sm:$0xff]  }
  0xc2   :  { %4927 = vmatprep.subr.bf16.mxu0 %v5465_v48  ;;  %v5508_v47 = vld [vmem:[#allocation3 + $0x20] sm:$0xff]  }
  0xc5   :  { %4928 = vmatpush3.bf16.msra.mxu0 %v5465_v48  ;;  %v5509_v48 = vld [vmem:[#allocation3 + $0x8c] sm:$0xff]  }
  0xc6   :  { %4929 = vmatprep.subr.bf16.mxu0 %v5471_v51 }
  0xc7   :  { %4650 = vmatmul.mubr.bf16.gmra.mrb[28].mxu1 %v5966_v59  ;;  %v5514_v59 = vld [vmem:[#allocation3 + $0x9c] sm:$0xff]  }
  0xc8   :  { %4894 = vmatmul.mubr.bf16.gmra.mrb[12].mxu0 %v5446_v55  ;;  %4653 = vmatprep.mubr.bf16.mxu1 %v5967_v60  ;;  %v5512_v55 = vld [vmem:[#allocation3 + $0x94] sm:$0xff]  }
  0xc9   :  { %4897 = vmatprep.mubr.bf16.mxu0 %v5450_v56  ;;  %4930 = vmatpush3.bf16.msra.mxu0 %v5471_v51  ;;  %v5511_v51 = vld [vmem:[#allocation3 + $0x28] sm:$0xff]   ;;  %v5565_v56 = vld [vmem:[#allocation6 + $0x108] sm:$0xff]   ;;  %v5516_v60 = vld [vmem:[#allocation3 + $0x38] sm:$0xff]  }
  0xca   :  { %4931 = vmatprep.subr.bf16.mxu0 %v5477_v58 }
  0xcd   :  { %4932 = vmatpush3.bf16.msra.mxu0 %v5477_v58  ;;  %v5513_v58 = vld [vmem:[#allocation3 + $0x30] sm:$0xff]  }
  0xce   :  { %4969 = vmatprep.subr.bf16.mxu0 %v5894_v62 }
  0xcf   :  { %4654 = vmatmul.mubr.bf16.gmra.mrb[32].mxu1 %v5968_v6  ;;  %v5519_v6 = vld [vmem:[#allocation3 + $0xac] sm:$0xff]  }
  0xd0   :  { %4898 = vmatmul.mubr.bf16.gmra.mrb[16].mxu0 %v5452_v0  ;;  %4673 = vmatprep.mubr.bf16.mxu1 %v5454_v3  ;;  %v5566_v0 = vld [vmem:[#allocation6 + $0x110] sm:$0xff]   ;;  %v5567_v3 = vld [vmem:[#allocation6 + $0x118] sm:$0xff]  }
  0xd1   :  { %4901 = vmatprep.mubr.bf16.mxu0 %v5455_v5  ;;  %v5518_v5 = vld [vmem:[#allocation3 + $0x40] sm:$0xff]  }
  0xd7   :  { %4674 = vmatmul.mubr.bf16.vlgmr.msra.gmra.mrb[0].mxu1 %v5456_v7  ;;  %v5521_v7 = vld [vmem:[#allocation3 + $0x48] sm:$0xff]  }
  0xd8   :  { %4902 = vmatmul.mubr.bf16.gmra.mrb[20].mxu0 %v5458_v9  ;;  %4710 = vmatpush3.bf16.msra.mxu1 %v5866_v27  ;;  %v5520_v27 = vld [vmem:[#allocation6 + $0x230] sm:$0xff]  }
  0xd9   :  { %4677 = vmatprep.mubr.bf16.mxu1 %v5460_v11  ;;  %4905 = vmatprep.mubr.bf16.mxu0 %v5461_v17  ;;  %v5522_v9 = vld [vmem:[#allocation3 + $0xb4] sm:$0xff]   ;;  %v5568_v11 = vld [vmem:[#allocation6 + $0x120] sm:$0xff]  }
  0xda   :  { %4711 = vmatprep.subr.bf16.mxu1 %v5464_v19  ;;  %v5569_v17 = vld [vmem:[#allocation6 + $0x128] sm:$0xff]  }
  0xdc   :  { %4712 = vmatpush3.bf16.msra.mxu1 %v5464_v19  ;;  %v5523_v19 = vld [vmem:[#allocation3 + $0x50] sm:$0xff]  }
  0xdd   :  { %4713 = vmatprep.subr.bf16.mxu1 %v5470_v26 }
  0xdf   :  { %4678 = vmatmul.mubr.bf16.gmra.mrb[4].mxu1 %v5462_v28  ;;  %v5526_v28 = vld [vmem:[#allocation3 + $0x58] sm:$0xff]  }
  0xe0   :  { %4906 = vmatmul.mubr.bf16.gmra.mrb[24].mxu0 %v5463_v36  ;;  %4681 = vmatprep.mubr.bf16.mxu1 %v5466_v39  ;;  %v5527_v36 = vld [vmem:[#allocation3 + $0x38] sm:$0xff]  }
  0xe1   :  { %4909 = vmatprep.mubr.bf16.mxu0 %v5467_v41  ;;  %4714 = vmatpush3.bf16.msra.mxu1 %v5470_v26  ;;  %v5524_v26 = vld [vmem:[#allocation3 + $0xbc] sm:$0xff]  }
  0xe2   :  { %4715 = vmatprep.subr.bf16.mxu1 %v5476_v45  ;;  %v5570_v39 = vld [vmem:[#allocation6 + $0x130] sm:$0xff]   ;;  %v5571_v41 = vld [vmem:[#allocation6 + $0x138] sm:$0xff]  }
  0xe5   :  { %4716 = vmatpush3.bf16.msra.mxu1 %v5476_v45  ;;  %v5528_v45 = vld [vmem:[#allocation3 + $0x60] sm:$0xff]  }
  0xe6   :  { %4717 = vmatprep.subr.bf16.mxu1 %v5482_v50 }
  0xe7   :  { %4682 = vmatmul.mubr.bf16.gmra.mrb[8].mxu1 %v5468_v49  ;;  %v5529_v49 = vld [vmem:[#allocation3 + $0x40] sm:$0xff]  }
  0xe8   :  { %4910 = vmatmul.mubr.bf16.gmra.mrb[28].mxu0 %v5469_v57  ;;  %4685 = vmatprep.mubr.bf16.mxu1 %v5472_v61  ;;  %v5531_v57 = vld [vmem:[#allocation3 + $0x48] sm:$0xff]   ;;  %v5532_v61 = vld [vmem:[#allocation3 + $0x70] sm:$0xff]  }
  0xe9   :  { %4913 = vmatprep.mubr.bf16.mxu0 %v5473_v8  ;;  %4718 = vmatpush3.bf16.msra.mxu1 %v5482_v50  ;;  %v5530_v50 = vld [vmem:[#allocation3 + $0x68] sm:$0xff]   ;;  %v5533_v8 = vld [vmem:[#allocation3 + $0x50] sm:$0xff]  }
  0xea   :  { %4719 = vmatprep.subr.bf16.mxu1 %v5488_v10 }
  0xed   :  { %4720 = vmatpush3.bf16.msra.mxu1 %v5488_v10  ;;  %v5534_v10 = vld [vmem:[#allocation3 + $0x78] sm:$0xff]  }
  0xee   :  { %4721 = vmatprep.subr.bf16.mxu1 %v5494_v42 }
  0xef   :  { %4686 = vmatmul.mubr.bf16.gmra.mrb[12].mxu1 %v5474_v29  ;;  %v5535_v29 = vld [vmem:[#allocation3 + $0x58] sm:$0xff]  }
  0xf0   :  { %4914 = vmatmul.mubr.bf16.gmra.mrb[32].mxu0 %v5475_v40  ;;  %4689 = vmatprep.mubr.bf16.mxu1 %v5478_v1  ;;  %v5536_v40 = vld [vmem:[#allocation3 + $0x80] sm:$0xff]   ;;  %v5538_v1 = vld [vmem:[#allocation3 + $0x88] sm:$0xff]  }
  0xf1   :  { %4933 = vmatprep.mubr.bf16.mxu0 %v5479_v54  ;;  %4722 = vmatpush3.bf16.msra.mxu1 %v5494_v42  ;;  %v5537_v42 = vld [vmem:[#allocation3 + $0x60] sm:$0xff]   ;;  %v5539_v54 = vld [vmem:[#allocation3 + $0x68] sm:$0xff]  }
  0xf2   :  { %4723 = vmatprep.subr.bf16.mxu1 %v5501_v63 }
  0xf5   :  { %4724 = vmatpush3.bf16.msra.mxu1 %v5501_v63  ;;  %v5540_v63 = vld [vmem:[#allocation3 + $0x90] sm:$0xff]  }
  0xf6   :  { %5021 = vmatprep.subr.bf16.mxu1 %v5901_v38 }
  0xf7   :  { %4690 = vmatmul.mubr.bf16.gmra.mrb[16].mxu1 %v5480_v53  ;;  %v5541_v53 = vld [vmem:[#allocation3 + $0x70] sm:$0xff]  }
  0xf8   :  { %4934 = vmatmul.mubr.bf16.vlgmr.msra.gmra.mrb[0].mxu0 %v5481_v4  ;;  %4693 = vmatprep.mubr.bf16.mxu1 %v5483_v15  ;;  %v5542_v4 = vld [vmem:[#allocation3 + $0x98] sm:$0xff]  }
  0xf9   :  { %4937 = vmatprep.mubr.bf16.mxu0 %v5484_v23  ;;  %4970 = vmatpush3.bf16.msra.mxu0 %v5894_v62  ;;  %v5517_v62 = vld [vmem:[#allocation3 + $0xa4] sm:$0xff]   ;;  %v5543_v15 = vld [vmem:[#allocation3 + $0x78] sm:$0xff]  }
  0xfa   :  { %4971 = vmatprep.subr.bf16.mxu0 %v5493_v32  ;;  %v5544_v23 = vld [vmem:[#allocation3 + $0xa0] sm:$0xff]  }
  0xfd   :  { %4972 = vmatpush3.bf16.msra.mxu0 %v5493_v32  ;;  %v5545_v32 = vld [vmem:[#allocation3 + $0x80] sm:$0xff]  }
  0xfe   :  { %4973 = vmatprep.subr.bf16.mxu0 %v5499_v12 }
  0xff   :  { %4694 = vmatmul.mubr.bf16.gmra.mrb[20].mxu1 %v5485_v18  ;;  %v5548_v18 = vld [vmem:[#allocation3 + $0x64] sm:$0xff]  }
 0x100   :  { %4938 = vmatmul.mubr.bf16.gmra.mrb[4].mxu0 %v5486_v2  ;;  %4697 = vmatprep.mubr.bf16.mxu1 %v5489_v52  ;;  %v5549_v2 = vld [vmem:[#allocation3 + $0x90] sm:$0xff]  }
 0x101   :  { %4941 = vmatprep.mubr.bf16.mxu0 %v5490_v13  ;;  %4974 = vmatpush3.bf16.msra.mxu0 %v5499_v12  ;;  %v5547_v12 = vld [vmem:[#allocation3 + $0x88] sm:$0xff]   ;;  %v5551_v13 = vld [vmem:[#allocation3 + $0x98] sm:$0xff]  }
 0x102   :  { %4975 = vmatprep.subr.bf16.mxu0 %v5505_v14  ;;  %v5550_v52 = vld [vmem:[#allocation3 + $0x6c] sm:$0xff]  }
 0x105   :  { %4976 = vmatpush3.bf16.msra.mxu0 %v5505_v14  ;;  %v5552_v14 = vld [vmem:[#allocation3 + $0x74] sm:$0xff]  }
 0x106   :  { %4977 = vmatprep.subr.bf16.mxu0 %v5510_v16 }
 0x107   :  { %4698 = vmatmul.mubr.bf16.gmra.mrb[24].mxu1 %v5491_v20  ;;  %v5554_v20 = vld [vmem:[#allocation3 + $0x7c] sm:$0xff]  }
 0x108   :  { %4942 = vmatmul.mubr.bf16.gmra.mrb[8].mxu0 %v5492_v21  ;;  %4701 = vmatprep.mubr.bf16.mxu1 %v5495_v22  ;;  %v5555_v21 = vld [vmem:[#allocation3 + $0xa8] sm:$0xff]  }
 0x109   :  { %4945 = vmatprep.mubr.bf16.mxu0 %v5496_v24  ;;  %4978 = vmatpush3.bf16.msra.mxu0 %v5510_v16  ;;  %v5553_v16 = vld [vmem:[#allocation3 + $0xa0] sm:$0xff]   ;;  %v5557_v24 = vld [vmem:[#allocation3 + $0xb0] sm:$0xff]  }
 0x10a   :  { %4979 = vmatprep.subr.bf16.mxu0 %v5515_v25  ;;  %v5556_v22 = vld [vmem:[#allocation3 + $0x84] sm:$0xff]  }
 0x10d   :  { %4980 = vmatpush3.bf16.msra.mxu0 %v5515_v25  ;;  %v5558_v25 = vld [vmem:[#allocation3 + $0x8c] sm:$0xff]  }
 0x10e   :  { %4981 = vmatprep.subr.bf16.mxu0 %v5520_v27 }
 0x10f   :  { %4702 = vmatmul.mubr.bf16.gmra.mrb[28].mxu1 %v5497_v30  ;;  %v5560_v30 = vld [vmem:[#allocation3 + $0x94] sm:$0xff]  }
 0x110   :  { %4946 = vmatmul.mubr.bf16.gmra.mrb[12].mxu0 %v5498_v31  ;;  %4705 = vmatprep.mubr.bf16.mxu1 %v5500_v33  ;;  %v5561_v31 = vld [vmem:[#allocation3 + $0xc0] sm:$0xff]  }
 0x111   :  { %4949 = vmatprep.mubr.bf16.mxu0 %v5502_v34  ;;  %4982 = vmatpush3.bf16.msra.mxu0 %v5520_v27  ;;  %v5559_v27 = vld [vmem:[#allocation3 + $0xb8] sm:$0xff]   ;;  %v5563_v34 = vld [vmem:[#allocation3 + $0xa4] sm:$0xff]  }
 0x112   :  { %4983 = vmatprep.subr.bf16.mxu0 %v5525_v35  ;;  %v5562_v33 = vld [vmem:[#allocation3 + $0x9c] sm:$0xff]  }
 0x115   :  { %4984 = vmatpush3.bf16.msra.mxu0 %v5525_v35 }
 0x117   :  { %4706 = vmatmul.mubr.bf16.gmra.mrb[32].mxu1 %v5503_v37 }
 0x118   :  { %4950 = vmatmul.mubr.bf16.gmra.mrb[16].mxu0 %v5504_v43  ;;  %4725 = vmatprep.mubr.bf16.mxu1 %v5506_v44 }
 0x119   :  { %4953 = vmatprep.mubr.bf16.mxu0 %v5507_v46 }
 0x11f   :  { %4726 = vmatmul.mubr.bf16.vlgmr.msra.gmra.mrb[0].mxu1 %v5508_v47 }
 0x120   :  { %4954 = vmatmul.mubr.bf16.gmra.mrb[20].mxu0 %v5509_v48  ;;  %5029 = vmatpush3.bf16.msra.mxu1 %v5901_v38  ;;  %v5546_v38 = vld [vmem:[#allocation3 + $0x5c] sm:$0xff]  }
 0x121   :  { %4729 = vmatprep.mubr.bf16.mxu1 %v5511_v51  ;;  %4957 = vmatprep.mubr.bf16.mxu0 %v5512_v55 }
 0x122   :  { %5022 = vmatprep.subr.bf16.mxu1 %v5565_v56 }
 0x124   :  { %5030 = vmatpush3.bf16.msra.mxu1 %v5565_v56 }
 0x125   :  { %5023 = vmatprep.subr.bf16.mxu1 %v5566_v0 }
 0x127   :  { %4730 = vmatmul.mubr.bf16.gmra.mrb[4].mxu1 %v5513_v58 }
 0x128   :  { %4958 = vmatmul.mubr.bf16.gmra.mrb[24].mxu0 %v5514_v59  ;;  %4733 = vmatprep.mubr.bf16.mxu1 %v5516_v60 }
 0x129   :  { %4961 = vmatprep.mubr.bf16.mxu0 %v5517_v62  ;;  %5031 = vmatpush3.bf16.msra.mxu1 %v5566_v0 }
 0x12a   :  { %5024 = vmatprep.subr.bf16.mxu1 %v5567_v3 }
 0x12d   :  { %5032 = vmatpush3.bf16.msra.mxu1 %v5567_v3 }
 0x12e   :  { %5025 = vmatprep.subr.bf16.mxu1 %v5568_v11 }
 0x12f   :  { %4734 = vmatmul.mubr.bf16.gmra.mrb[8].mxu1 %v5518_v5 }
 0x130   :  { %4962 = vmatmul.mubr.bf16.gmra.mrb[28].mxu0 %v5519_v6  ;;  %4737 = vmatprep.mubr.bf16.mxu1 %v5521_v7 }
 0x131   :  { %4965 = vmatprep.mubr.bf16.mxu0 %v5522_v9  ;;  %5033 = vmatpush3.bf16.msra.mxu1 %v5568_v11  ;;  %v5909_v9 = vld [vmem:[%s5964_s2] ss:$0 sm:$0xff]  ;;  %s5648_s2 = smov [#allocation8]  }
 0x132   :  { %5026 = vmatprep.subr.bf16.mxu1 %v5569_v17  ;;  %s3892_s11 = sshll.u32 %s5648_s2, 4  ;;  %s3893_s11 = int_to_ptr.vmem [resolvable:$true] %s3892_s11 }
 0x133   :  { %s5616_s12 = scalar_lea.vmem %s3893_s11, 2304  ;;  %p5621_p3 = scmp.lt.s32.totalorder %s3893_s11, %s3893_s11 }
 0x134   :  { %p5617_p2 = scmp.ne.s32.totalorder %s3893_s11, %s5616_s12  ;;  %p5622_p4 = scmp.lt.s32.totalorder %s5616_s12, %s5616_s12 }
 0x135   :  { %5034 = vmatpush3.bf16.msra.mxu1 %v5569_v17 }
 0x136   :  { %5027 = vmatprep.subr.bf16.mxu1 %v5570_v39  ;;  %p5623_p5 = por %p5622_p4, %p5621_p3 }
 0x137   :  { %4738 = vmatmul.mubr.bf16.gmra.mrb[12].mxu1 %v5523_v19 }
 0x138   :  { %4966 = vmatmul.mubr.bf16.gmra.mrb[32].mxu0 %v5524_v26  ;;  %4741 = vmatprep.mubr.bf16.mxu1 %v5526_v28  ;;  %p5624_p6 = pnand %p5623_p5, %p5617_p2 }
 0x139   :  { %4985 = vmatprep.mubr.bf16.mxu0 %v5527_v36  ;;  %5035 = vmatpush3.bf16.msra.mxu1 %v5570_v39 }
 0x13a   :  { %5028 = vmatprep.subr.bf16.mxu1 %v5571_v41 }
 0x13d   :  { %5036 = vmatpush3.bf16.msra.mxu1 %v5571_v41 }
 0x13f   :  { %4742 = vmatmul.mubr.bf16.gmra.mrb[16].mxu1 %v5528_v45 }
 0x140   :  { %4986 = vmatmul.mubr.bf16.vlgmr.msra.gmra.mrb[0].mxu0 %v5529_v49  ;;  %4745 = vmatprep.mubr.bf16.mxu1 %v5530_v50 }
 0x141   :  { %4989 = vmatprep.mubr.bf16.mxu0 %v5531_v57 }
 0x147   :  { %4746 = vmatmul.mubr.bf16.gmra.mrb[20].mxu1 %v5532_v61 }
 0x148   :  { %4990 = vmatmul.mubr.bf16.gmra.mrb[4].mxu0 %v5533_v8  ;;  %4749 = vmatprep.mubr.bf16.mxu1 %v5534_v10 }
 0x149   :  { %4993 = vmatprep.mubr.bf16.mxu0 %v5535_v29 }
 0x14f   :  { %4750 = vmatmul.mubr.bf16.gmra.mrb[24].mxu1 %v5536_v40 }
 0x150   :  { %4994 = vmatmul.mubr.bf16.gmra.mrb[8].mxu0 %v5537_v42  ;;  %4753 = vmatprep.mubr.bf16.mxu1 %v5538_v1 }
 0x151   :  { %4997 = vmatprep.mubr.bf16.mxu0 %v5539_v54 }
 0x157   :  { %4754 = vmatmul.mubr.bf16.gmra.mrb[28].mxu1 %v5540_v63 }
 0x158   :  { %4998 = vmatmul.mubr.bf16.gmra.mrb[12].mxu0 %v5541_v53  ;;  %4757 = vmatprep.mubr.bf16.mxu1 %v5542_v4 }
 0x159   :  { %5001 = vmatprep.mubr.bf16.mxu0 %v5543_v15 }
 0x15f   :  { %4758 = vmatmul.mubr.bf16.gmra.mrb[32].mxu1 %v5544_v23 }
 0x160   :  { %5002 = vmatmul.mubr.bf16.gmra.mrb[16].mxu0 %v5545_v32  ;;  %4793 = vmatprep.mubr.bf16.mxu1 %v5546_v38 }
 0x161   :  { %5005 = vmatprep.mubr.bf16.mxu0 %v5547_v12 }
 0x167   :  { %4794 = vmatmul.mubr.bf16.vlgmr.msra.gmra.mrb[16].mxu1 %v5548_v18 }
 0x168   :  { %5006 = vmatmul.mubr.bf16.gmra.mrb[20].mxu0 %v5549_v2  ;;  %4797 = vmatprep.mubr.bf16.mxu1 %v5550_v52 }
 0x169   :  { %5009 = vmatprep.mubr.bf16.mxu0 %v5551_v13 }
 0x16f   :  { %4798 = vmatmul.mubr.bf16.gmra.mrb[20].mxu1 %v5552_v14 }
 0x170   :  { %5010 = vmatmul.mubr.bf16.gmra.mrb[24].mxu0 %v5553_v16  ;;  %4801 = vmatprep.mubr.bf16.mxu1 %v5554_v20 }
 0x171   :  { %5013 = vmatprep.mubr.bf16.mxu0 %v5555_v21 }
 0x177   :  { %4802 = vmatmul.mubr.bf16.gmra.mrb[24].mxu1 %v5556_v22 }
 0x178   :  { %5014 = vmatmul.mubr.bf16.gmra.mrb[28].mxu0 %v5557_v24  ;;  %4805 = vmatprep.mubr.bf16.mxu1 %v5558_v25 }
 0x179   :  { %5017 = vmatprep.mubr.bf16.mxu0 %v5559_v27 }
 0x17f   :  { %4806 = vmatmul.mubr.bf16.gmra.mrb[28].mxu1 %v5560_v30 }
 0x180   :  { %5018 = vmatmul.mubr.bf16.gmra.mrb[32].mxu0 %v5561_v31  ;;  %4809 = vmatprep.mubr.bf16.mxu1 %v5562_v33 }
 0x187   :  { %4810 = vmatmul.mubr.bf16.gmra.mrb[32].mxu1 %v5563_v34 }
 0x1f2   :  { %v4727_v35 = vpop.f32.mrb[0].mxu1 }
 0x1f3   :  { %v1375_v37 = vpop.f32.mrb[1].mxu1 }
 0x1f4   :  { %v4728_v43 = vpop.f32.mrb[2].mxu1 }
 0x1f5   :  { %v1378_v44 = vpop.f32.mrb[3].mxu1 }
 0x1fa   :  { %v4731_v46 = vpop.f32.mrb[4].mxu1 }
 0x1fb   :  { %v1391_v47 = vpop.f32.mrb[5].mxu1 }
 0x1fc   :  { %v4732_v48 = vpop.f32.mrb[6].mxu1 }
 0x1fd   :  { %v1394_v51 = vpop.f32.mrb[7].mxu1 }
 0x202   :  { %v4735_v55 = vpop.f32.mrb[8].mxu1 }
 0x203   :  { %v1407_v56 = vpop.f32.mrb[9].mxu1 }
 0x204   :  { %v4736_v58 = vpop.f32.mrb[10].mxu1 }
 0x205   :  { %v1410_v59 = vpop.f32.mrb[11].mxu1 }
 0x20a   :  { %v4739_v60 = vpop.f32.mrb[12].mxu1 }
 0x20b   :  { %v1423_v62 = vpop.f32.mrb[13].mxu1 }
 0x20c   :  { %v4740_v0 = vpop.f32.mrb[14].mxu1 }
 0x20d   :  { %v1426_v3 = vpop.f32.mrb[15].mxu1 }
 0x213   :  { %v4987_v5 = vpop.f32.mrb[0].mxu0 }
 0x214   :  { %v5037_v6 = vadd.f32 %v4987_v5, %v4727_v35  ;;  %v3485_v7 = vpop.f32.mrb[1].mxu0 }
 0x215   :  { %v5038_v11 = vadd.f32 %v3485_v7, %v1375_v37  ;;  %v4988_v17 = vpop.f32.mrb[2].mxu0 }
 0x216   :  { %v5039_v19 = vadd.f32 %v4988_v17, %v4728_v43  ;;  %v3488_v26 = vpop.f32.mrb[3].mxu0  ;;  %v3673_v36 = vadd.f32 %v5037_v6, %v5909_v9 }
 0x217   :  { %v5040_v28 = vadd.f32 %v3488_v26, %v1378_v44  ;;  %v3671_v41 = vadd.f32 %v5038_v11, %v5909_v9 }
 0x218   :  { %v3674_v39 = vadd.f32 %v5039_v19, %v5909_v9 }
 0x219   :  { %v3672_v45 = vadd.f32 %v5040_v28, %v5909_v9 }
 0x21a   :  { %v4220_v49 = vpack.c.bf16 %v3674_v39, %v3673_v36 }
 0x21b   :  { %v4215_v50 = vpack.c.bf16 %v3672_v45, %v3671_v41  ;;  %v4991_v57 = vpop.f32.mrb[4].mxu0 }
 0x21c   :  { %4302 = vst [vmem:[#allocation8 + $0x8] sm:$0xff] %v4220_v49   ;;  %v5041_v61 = vadd.f32 %v4991_v57, %v4731_v46  ;;  %v3501_v8 = vpop.f32.mrb[5].mxu0 }
 0x21d   :  { %4216 = vst [vmem:[#allocation8] sm:$0xff] %v4215_v50   ;;  %v5042_v10 = vadd.f32 %v3501_v8, %v1391_v47  ;;  %v4992_v29 = vpop.f32.mrb[6].mxu0 }
 0x21e   :  { %v5043_v40 = vadd.f32 %v4992_v29, %v4732_v48  ;;  %v3504_v42 = vpop.f32.mrb[7].mxu0  ;;  %v3677_v54 = vadd.f32 %v5041_v61, %v5909_v9 }
 0x21f   :  { %v5044_v1 = vadd.f32 %v3504_v42, %v1394_v51  ;;  %v3675_v53 = vadd.f32 %v5042_v10, %v5909_v9 }
 0x220   :  { %v3678_v63 = vadd.f32 %v5043_v40, %v5909_v9 }
 0x221   :  { %v3676_v4 = vadd.f32 %v5044_v1, %v5909_v9 }
 0x222   :  { %v4230_v15 = vpack.c.bf16 %v3678_v63, %v3677_v54 }
 0x223   :  { %v4225_v23 = vpack.c.bf16 %v3676_v4, %v3675_v53  ;;  %v4995_v32 = vpop.f32.mrb[8].mxu0 }
 0x224   :  { %4304 = vst [vmem:[#allocation8 + $0x18] sm:$0xff] %v4230_v15   ;;  %v5045_v38 = vadd.f32 %v4995_v32, %v4735_v55  ;;  %v3517_v12 = vpop.f32.mrb[9].mxu0 }
 0x225   :  { %4303 = vst [vmem:[#allocation8 + $0x10] sm:$0xff] %v4225_v23   ;;  %v5046_v18 = vadd.f32 %v3517_v12, %v1407_v56  ;;  %v4996_v2 = vpop.f32.mrb[10].mxu0 }
 0x226   :  { %v5047_v52 = vadd.f32 %v4996_v2, %v4736_v58  ;;  %v3520_v13 = vpop.f32.mrb[11].mxu0  ;;  %v3681_v16 = vadd.f32 %v5045_v38, %v5909_v9 }
 0x227   :  { %v5048_v14 = vadd.f32 %v3520_v13, %v1410_v59  ;;  %v3679_v21 = vadd.f32 %v5046_v18, %v5909_v9 }
 0x228   :  { %v3682_v20 = vadd.f32 %v5047_v52, %v5909_v9 }
 0x229   :  { %v3680_v22 = vadd.f32 %v5048_v14, %v5909_v9 }
 0x22a   :  { %v4240_v24 = vpack.c.bf16 %v3682_v20, %v3681_v16 }
 0x22b   :  { %v4235_v25 = vpack.c.bf16 %v3680_v22, %v3679_v21  ;;  %v4999_v27 = vpop.f32.mrb[12].mxu0 }
 0x22c   :  { %4306 = vst [vmem:[#allocation8 + $0x28] sm:$0xff] %v4240_v24   ;;  %v5049_v30 = vadd.f32 %v4999_v27, %v4739_v60  ;;  %v3533_v31 = vpop.f32.mrb[13].mxu0 }
 0x22d   :  { %4305 = vst [vmem:[#allocation8 + $0x20] sm:$0xff] %v4235_v25   ;;  %v5050_v33 = vadd.f32 %v3533_v31, %v1423_v62  ;;  %v5000_v34 = vpop.f32.mrb[14].mxu0 }
 0x22e   :  { %v5051_v35 = vadd.f32 %v5000_v34, %v4740_v0  ;;  %v3536_v37 = vpop.f32.mrb[15].mxu0  ;;  %v3685_v44 = vadd.f32 %v5049_v30, %v5909_v9 }
 0x22f   :  { %v5052_v43 = vadd.f32 %v3536_v37, %v1426_v3  ;;  %v3683_v47 = vadd.f32 %v5050_v33, %v5909_v9 }
 0x230   :  { %v3686_v46 = vadd.f32 %v5051_v35, %v5909_v9 }
 0x231   :  { %v3684_v48 = vadd.f32 %v5052_v43, %v5909_v9 }
 0x232   :  { %v4250_v51 = vpack.c.bf16 %v3686_v46, %v3685_v44 }
 0x233   :  { %v4245_v55 = vpack.c.bf16 %v3684_v48, %v3683_v47  ;;  %v5003_v56 = vpop.f32.mrb[16].mxu0 }
 0x234   :  { %4308 = vst [vmem:[#allocation8 + $0x38] sm:$0xff] %v4250_v51   ;;  %v3549_v58 = vpop.f32.mrb[17].mxu0 }
 0x235   :  { %4307 = vst [vmem:[#allocation8 + $0x30] sm:$0xff] %v4245_v55   ;;  %v5004_v59 = vpop.f32.mrb[18].mxu0 }
 0x236   :  { %v3552_v60 = vpop.f32.mrb[19].mxu0 }
 0x23a   :  { %v4795_v62 = vpop.f32.mrb[16].mxu1 }
 0x23b   :  { %v5053_v0 = vadd.f32 %v5003_v56, %v4795_v62  ;;  %v5007_v5 = vpop.f32.mrb[20].mxu0  ;;  %v1861_v3 = vpop.f32.mrb[17].mxu1 }
 0x23c   :  { %v5054_v6 = vadd.f32 %v3549_v58, %v1861_v3  ;;  %v3565_v7 = vpop.f32.mrb[21].mxu0  ;;  %v4796_v11 = vpop.f32.mrb[18].mxu1 }
 0x23d   :  { %v5055_v17 = vadd.f32 %v5004_v59, %v4796_v11  ;;  %v5008_v19 = vpop.f32.mrb[22].mxu0  ;;  %v1864_v26 = vpop.f32.mrb[19].mxu1  ;;  %v3689_v39 = vadd.f32 %v5053_v0, %v5909_v9 }
 0x23e   :  { %v5056_v28 = vadd.f32 %v3552_v60, %v1864_v26  ;;  %v3568_v36 = vpop.f32.mrb[23].mxu0  ;;  %v3687_v45 = vadd.f32 %v5054_v6, %v5909_v9 }
 0x23f   :  { %v3690_v41 = vadd.f32 %v5055_v17, %v5909_v9 }
 0x240   :  { %v3688_v49 = vadd.f32 %v5056_v28, %v5909_v9 }
 0x241   :  { %v4260_v50 = vpack.c.bf16 %v3690_v41, %v3689_v39 }
 0x242   :  { %v4255_v57 = vpack.c.bf16 %v3688_v49, %v3687_v45  ;;  %v4799_v61 = vpop.f32.mrb[20].mxu1 }
 0x243   :  { %4310 = vst [vmem:[#allocation8 + $0x48] sm:$0xff] %v4260_v50   ;;  %v5057_v8 = vadd.f32 %v5007_v5, %v4799_v61  ;;  %v5011_v10 = vpop.f32.mrb[24].mxu0  ;;  %v1877_v29 = vpop.f32.mrb[21].mxu1 }
 0x244   :  { %4309 = vst [vmem:[#allocation8 + $0x40] sm:$0xff] %v4255_v57   ;;  %v5058_v40 = vadd.f32 %v3565_v7, %v1877_v29  ;;  %v3581_v42 = vpop.f32.mrb[25].mxu0  ;;  %v4800_v1 = vpop.f32.mrb[22].mxu1 }
 0x245   :  { %v5059_v54 = vadd.f32 %v5008_v19, %v4800_v1  ;;  %v5012_v63 = vpop.f32.mrb[26].mxu0  ;;  %v1880_v53 = vpop.f32.mrb[23].mxu1  ;;  %v3693_v23 = vadd.f32 %v5057_v8, %v5909_v9 }
 0x246   :  { %v5060_v4 = vadd.f32 %v3568_v36, %v1880_v53  ;;  %v3584_v15 = vpop.f32.mrb[27].mxu0  ;;  %v3691_v38 = vadd.f32 %v5058_v40, %v5909_v9 }
 0x247   :  { %v3694_v32 = vadd.f32 %v5059_v54, %v5909_v9 }
 0x248   :  { %v3692_v12 = vadd.f32 %v5060_v4, %v5909_v9 }
 0x249   :  { %v4270_v18 = vpack.c.bf16 %v3694_v32, %v3693_v23 }
 0x24a   :  { %v4265_v2 = vpack.c.bf16 %v3692_v12, %v3691_v38  ;;  %v4803_v52 = vpop.f32.mrb[24].mxu1 }
 0x24b   :  { %4312 = vst [vmem:[#allocation8 + $0x58] sm:$0xff] %v4270_v18   ;;  %v5061_v13 = vadd.f32 %v5011_v10, %v4803_v52  ;;  %v5015_v14 = vpop.f32.mrb[28].mxu0  ;;  %v1893_v16 = vpop.f32.mrb[25].mxu1 }
 0x24c   :  { %4311 = vst [vmem:[#allocation8 + $0x50] sm:$0xff] %v4265_v2   ;;  %v5062_v20 = vadd.f32 %v3581_v42, %v1893_v16  ;;  %v3597_v21 = vpop.f32.mrb[29].mxu0  ;;  %v4804_v22 = vpop.f32.mrb[26].mxu1 }
 0x24d   :  { %v5063_v24 = vadd.f32 %v5012_v63, %v4804_v22  ;;  %v5016_v25 = vpop.f32.mrb[30].mxu0  ;;  %v1896_v27 = vpop.f32.mrb[27].mxu1  ;;  %v3697_v33 = vadd.f32 %v5061_v13, %v5909_v9 }
 0x24e   :  { %v5064_v30 = vadd.f32 %v3584_v15, %v1896_v27  ;;  %v3600_v31 = vpop.f32.mrb[31].mxu0  ;;  %v3695_v35 = vadd.f32 %v5062_v20, %v5909_v9 }
 0x24f   :  { %v3698_v34 = vadd.f32 %v5063_v24, %v5909_v9 }
 0x250   :  { %v3696_v37 = vadd.f32 %v5064_v30, %v5909_v9 }
 0x251   :  { %v4280_v43 = vpack.c.bf16 %v3698_v34, %v3697_v33 }
 0x252   :  { %v4275_v44 = vpack.c.bf16 %v3696_v37, %v3695_v35  ;;  %v4807_v46 = vpop.f32.mrb[28].mxu1 }
 0x253   :  { %4314 = vst [vmem:[#allocation8 + $0x68] sm:$0xff] %v4280_v43   ;;  %v5065_v47 = vadd.f32 %v5015_v14, %v4807_v46  ;;  %v5019_v48 = vpop.f32.mrb[32].mxu0  ;;  %v1909_v51 = vpop.f32.mrb[29].mxu1 }
 0x254   :  { %4313 = vst [vmem:[#allocation8 + $0x60] sm:$0xff] %v4275_v44   ;;  %v5066_v55 = vadd.f32 %v3597_v21, %v1909_v51  ;;  %v3613_v56 = vpop.f32.mrb[33].mxu0  ;;  %v4808_v58 = vpop.f32.mrb[30].mxu1 }
 0x255   :  { %v5067_v59 = vadd.f32 %v5016_v25, %v4808_v58  ;;  %v5020_v60 = vpop.f32.mrb[34].mxu0  ;;  %v1912_v62 = vpop.f32.mrb[31].mxu1  ;;  %v3701_v3 = vadd.f32 %v5065_v47, %v5909_v9 }
 0x256   :  { %v5068_v0 = vadd.f32 %v3600_v31, %v1912_v62  ;;  %v3616_v5 = vpop.f32.mrb[35].mxu0  ;;  %v3699_v7 = vadd.f32 %v5066_v55, %v5909_v9 }
 0x257   :  { %v3702_v6 = vadd.f32 %v5067_v59, %v5909_v9 }
 0x258   :  { %v3700_v11 = vadd.f32 %v5068_v0, %v5909_v9 }
 0x259   :  { %v4290_v17 = vpack.c.bf16 %v3702_v6, %v3701_v3 }
 0x25a   :  { %v4285_v19 = vpack.c.bf16 %v3700_v11, %v3699_v7  ;;  %v4811_v26 = vpop.f32.mrb[32].mxu1 }
 0x25b   :  { %4316 = vst [vmem:[#allocation8 + $0x78] sm:$0xff] %v4290_v17   ;;  %v5069_v28 = vadd.f32 %v5019_v48, %v4811_v26  ;;  %v1925_v36 = vpop.f32.mrb[33].mxu1 }
 0x25c   :  { %4315 = vst [vmem:[#allocation8 + $0x70] sm:$0xff] %v4285_v19   ;;  %v5070_v39 = vadd.f32 %v3613_v56, %v1925_v36  ;;  %v4812_v41 = vpop.f32.mrb[34].mxu1 }
 0x25d   :  { %v5071_v45 = vadd.f32 %v5020_v60, %v4812_v41  ;;  %v1928_v49 = vpop.f32.mrb[35].mxu1  ;;  %v3705_v57 = vadd.f32 %v5069_v28, %v5909_v9 }
 0x25e   :  { %v5072_v50 = vadd.f32 %v3616_v5, %v1928_v49  ;;  %v3703_v8 = vadd.f32 %v5070_v39, %v5909_v9 }
 0x25f   :  { %v3706_v61 = vadd.f32 %v5071_v45, %v5909_v9 }
 0x260   :  { %v3704_v10 = vadd.f32 %v5072_v50, %v5909_v9 }
 0x261   :  { %v4300_v29 = vpack.c.bf16 %v3706_v61, %v3705_v57 }
 0x262   :  { %v4295_v40 = vpack.c.bf16 %v3704_v10, %v3703_v8 }
 0x263   :  { %4318 = vst [vmem:[#allocation8 + $0x88] sm:$0xff] %v4300_v29  }
 0x264   :  { %4317 = vst [vmem:[#allocation8 + $0x80] sm:$0xff] %v4295_v40  }
 0x265   :  { %5627 = shalt.err (!%p5624_p6)
}
 0x266   :  { %s5628_s15 = scalar_lea.hbm %s5965_s3, 2304 }
 0x267   :  { %p5629_p7 = scmp.ne.s32.totalorder %s5965_s3, %s5628_s15  ;;  %p5632_p8 = scmp.lt.u32.totalorder %s5628_s15, %s5965_s3 }
 0x269   :  { %p5634_p9 = pnand %p5632_p8, %p5629_p7 }
 0x26b   :  { %5637 = shalt.err (!%p5634_p9)
}
 0x26c   :  { %3898 = dma.vmem_to_hbm [thread:$0]  %s3893_s11, 2304, %s5965_s3, [#allocation5], %s5645_s22, %s5645_s22, %s5646_s23  }
 0x26d   :  { %5642 = dma.done.wait [#allocation5], 2304  }
 0x26e   :  { %5643 = vsyncadd [#allocation5], 4294964992 }
 0x26f   :  { %3902 = vsyncpa [#allocation4], 1 }
 0x270   :  { %3903 = vsyncpa [#allocation7], 1 }
 0x271   :  { %3904 = vsyncpa [#allocation5], 1 }

</bundles_post_ra>
